<compile_context>
chip_gen: v5e
topology: v5e:2x2
jax: 0.10.0
libtpu: 0.0.40
codegen_flags: <defaults>
</compile_context>

<pallas_src>
import jax
import jax.numpy as jnp
from jax.experimental import pallas as pl
from jax.experimental.pallas import tpu as pltpu

IN_FEATURES = 28 * 28      # 784
HIDDEN = 256
MAX_TB = 1024              # max batch-tile rows (multiple of 8)


def _round_up(x, m):
    return ((x + m - 1) // m) * m


def _cdiv(a, b):
    return -(-a // b)


def _choose_tile(batch):
    """Balanced batch tile: small padding, >=2 tiles for v7x when B is big."""
    num_tiles = _cdiv(batch, MAX_TB)
    if batch > 128:
        # Guarantee at least 2 grid steps so the "parallel" batch axis can be
        # sharded across both v7x TensorCores.
        num_tiles = max(2, num_tiles)
    tb = _round_up(_cdiv(batch, num_tiles), 8)
    return max(tb, 8)


def _mlp_kernel(x_ref, w1_ref, b1_ref, w2_ref, b2_ref, o_ref):
    """Fused Linear(784->256) -> ReLU -> Linear(256->784) -> Sigmoid on one tile.

    x_ref : (TB, 784)   f32   (batch tile, pipelined over the grid)
    w1_ref: (784, 256)  bf16  (resident: constant index_map)
    b1_ref: (1, 256)    f32
    w2_ref: (256, 784)  bf16  (resident)
    b2_ref: (1, 784)    f32
    o_ref : (TB, 784)   f32
    """
    # In-kernel cast to bf16 (VPU) — hidden under the activation DMA.
    x = x_ref[...].astype(jnp.bfloat16)
    # Layer 1: bf16 x bf16 MXU matmul, f32 accumulation; bias + ReLU on VPU.
    h = jnp.dot(x, w1_ref[...], preferred_element_type=jnp.float32) + b1_ref[...]
    h = jnp.maximum(h, 0.0)
    # Layer 2.
    y = jnp.dot(h.astype(jnp.bfloat16), w2_ref[...],
                preferred_element_type=jnp.float32) + b2_ref[...]
    # Exact sigmoid = 1 / (1 + exp(-y)); exp + reciprocal land on the EUP slot.
    o_ref[...] = pl.reciprocal(1.0 + jnp.exp(-y))


@jax.jit
def net_forward(x, w1, b1, w2, b2):
    """x: (B, 1, 28, 28) float32 -> (B, 1, 28, 28) float32."""
    B = x.shape[0]
    # Same semantics as torch .view(-1, 784); stays f32 (cast happens in-kernel).
    x_flat = x.reshape(B, IN_FEATURES)

    tb = _choose_tile(B)
    b_pad = _round_up(B, tb)
    if b_pad != B:
        x_flat = jnp.pad(x_flat, ((0, b_pad - B), (0, 0)))
    grid = b_pad // tb

    out_flat = pl.pallas_call(
        _mlp_kernel,
        out_shape=jax.ShapeDtypeStruct((b_pad, IN_FEATURES), jnp.float32),
        grid_spec=pltpu.PrefetchScalarGridSpec(
            num_scalar_prefetch=0,
            grid=(grid,),
            in_specs=[
                # Activations: tiled over the batch grid axis (pipelined).
                pl.BlockSpec((tb, IN_FEATURES), lambda i: (i, 0)),
                # Weights / biases: constant block index -> fetched once, resident.
                pl.BlockSpec((IN_FEATURES, HIDDEN), lambda i: (0, 0)),
                pl.BlockSpec((1, HIDDEN), lambda i: (0, 0)),
                pl.BlockSpec((HIDDEN, IN_FEATURES), lambda i: (0, 0)),
                pl.BlockSpec((1, IN_FEATURES), lambda i: (0, 0)),
            ],
            out_specs=pl.BlockSpec((tb, IN_FEATURES), lambda i: (i, 0)),
        ),
        compiler_params=pltpu.CompilerParams(
            # Independent batch tiles -> parallel (sharded across v7x's 2 TCs).
            dimension_semantics=("parallel",),
            # Explicit scoped-VMEM budget so TB=1024 double-buffered f32 tiles
            # are safe on all generations (fits v7x's 64 MiB physical VMEM).
            vmem_limit_bytes=48 * 1024 * 1024,
        ),
    )(x_flat, w1, b1, w2, b2)

    return out_flat[:B].reshape(B, 1, 28, 28)


def init_params(key):
    """Init mimicking PyTorch Linear default (U[-1/sqrt(fan_in), +1/sqrt(fan_in)]).

    Weights stored (in, out) for x @ W, kept in bf16 for native MXU rate and
    half the weight HBM traffic; biases stay f32.
    """
    k1, k2, k3, k4 = jax.random.split(key, 4)
    bound1 = 1.0 / jnp.sqrt(jnp.float32(IN_FEATURES))
    bound2 = 1.0 / jnp.sqrt(jnp.float32(HIDDEN))
    w1 = jax.random.uniform(k1, (IN_FEATURES, HIDDEN), jnp.float32,
                            -bound1, bound1).astype(jnp.bfloat16)
    b1 = jax.random.uniform(k2, (1, HIDDEN), jnp.float32, -bound1, bound1)
    w2 = jax.random.uniform(k3, (HIDDEN, IN_FEATURES), jnp.float32,
                            -bound2, bound2).astype(jnp.bfloat16)
    b2 = jax.random.uniform(k4, (1, IN_FEATURES), jnp.float32, -bound2, bound2)
    return w1, b1, w2, b2


if __name__ == "__main__":
    key = jax.random.PRNGKey(0)
    k_x, k_p = jax.random.split(key)

    B = 2
    x = jax.random.normal(k_x, (B, 1, 28, 28), jnp.float32)
    w1, b1, w2, b2 = init_params(k_p)

    out = net_forward(x, w1, b1, w2, b2)
    jax.block_until_ready(out)

    # Pure-JAX reference of the same math on the same bf16-rounded operands
    # (remaining delta: in-kernel bf16 rounding of x and h before each matmul).
    x_q = x.reshape(B, IN_FEATURES).astype(jnp.bfloat16).astype(jnp.float32)
    ref = jax.nn.sigmoid(
        jnp.maximum(x_q @ w1.astype(jnp.float32) + b1, 0.0)
        @ w2.astype(jnp.float32) + b2
    ).reshape(B, 1, 28, 28)

    assert out.shape == (B, 1, 28, 28)
    assert out.dtype == jnp.float32
    assert jnp.allclose(out, ref, atol=1e-2, rtol=1e-2)

    print("KERNEL_OK")
</pallas_src>

<mosaic_0001>
module attributes {stable_mosaic.version = 11 : i64} {
  func.func @_mlp_kernel(%arg0: i32, %arg1: memref<8x784xf32, #tpu.memory_space<vmem>>, %arg2: memref<784x256xbf16, #tpu.memory_space<vmem>>, %arg3: memref<1x256xf32, #tpu.memory_space<vmem>>, %arg4: memref<256x784xbf16, #tpu.memory_space<vmem>>, %arg5: memref<1x784xf32, #tpu.memory_space<vmem>>, %arg6: memref<8x784xf32, #tpu.memory_space<vmem>>) attributes {dimension_semantics = [#tpu.dimension_semantics<parallel>], iteration_bounds = array<i64: 1>, scalar_prefetch = 0 : i64, scratch_operands = 0 : i64, tpu.core_type = #tpu.core_type<tc>, window_params = [{transform_indices = @transform_0, window_bounds = array<i64: 8, 784>}, {pipeline_mode = #tpu.pipeline_mode<synchronous>, transform_indices = @transform_1, window_bounds = array<i64: 784, 256>}, {pipeline_mode = #tpu.pipeline_mode<synchronous>, transform_indices = @transform_2, window_bounds = array<i64: 1, 256>}, {pipeline_mode = #tpu.pipeline_mode<synchronous>, transform_indices = @transform_3, window_bounds = array<i64: 256, 784>}, {pipeline_mode = #tpu.pipeline_mode<synchronous>, transform_indices = @transform_4, window_bounds = array<i64: 1, 784>}, {transform_indices = @transform_5, window_bounds = array<i64: 8, 784>}]} {
    %c0 = arith.constant 0 : index
    %c0_0 = arith.constant 0 : index
    %0 = vector.load %arg1[%c0, %c0_0] : memref<8x784xf32, #tpu.memory_space<vmem>>, vector<8x784xf32>
    %1 = arith.truncf %0 : vector<8x784xf32> to vector<8x784xbf16>
    %c0_1 = arith.constant 0 : index
    %c0_2 = arith.constant 0 : index
    %2 = vector.load %arg2[%c0_1, %c0_2] : memref<784x256xbf16, #tpu.memory_space<vmem>>, vector<784x256xbf16>
    %cst = arith.constant dense<0.000000e+00> : vector<8x256xf32>
    %3 = tpu.matmul %1, %2, %cst {dimension_numbers = #tpu.dot_dimension_numbers<[1], [0], [0], [1], [0, 0, 1, 1], [], []>} : vector<8x784xbf16>, vector<784x256xbf16>, vector<8x256xf32> -> vector<8x256xf32>
    %c0_3 = arith.constant 0 : index
    %c0_4 = arith.constant 0 : index
    %4 = vector.load %arg3[%c0_3, %c0_4] : memref<1x256xf32, #tpu.memory_space<vmem>>, vector<1x256xf32>
    %5 = vector.broadcast %4 : vector<1x256xf32> to vector<8x256xf32>
    %6 = arith.addf %3, %5 : vector<8x256xf32>
    %cst_5 = arith.constant 0.000000e+00 : f32
    %7 = vector.broadcast %cst_5 : f32 to vector<8x256xf32>
    %8 = arith.maximumf %6, %7 : vector<8x256xf32>
    %9 = arith.truncf %8 : vector<8x256xf32> to vector<8x256xbf16>
    %c0_6 = arith.constant 0 : index
    %c0_7 = arith.constant 0 : index
    %10 = vector.load %arg4[%c0_6, %c0_7] : memref<256x784xbf16, #tpu.memory_space<vmem>>, vector<256x784xbf16>
    %cst_8 = arith.constant dense<0.000000e+00> : vector<8x784xf32>
    %11 = tpu.matmul %9, %10, %cst_8 {dimension_numbers = #tpu.dot_dimension_numbers<[1], [0], [0], [1], [0, 0, 1, 1], [], []>} : vector<8x256xbf16>, vector<256x784xbf16>, vector<8x784xf32> -> vector<8x784xf32>
    %c0_9 = arith.constant 0 : index
    %c0_10 = arith.constant 0 : index
    %12 = vector.load %arg5[%c0_9, %c0_10] : memref<1x784xf32, #tpu.memory_space<vmem>>, vector<1x784xf32>
    %13 = vector.broadcast %12 : vector<1x784xf32> to vector<8x784xf32>
    %14 = arith.addf %11, %13 : vector<8x784xf32>
    %cst_11 = arith.constant 0.000000e+00 : f32
    %15 = vector.broadcast %cst_11 : f32 to vector<8x784xf32>
    %16 = arith.subf %15, %14 : vector<8x784xf32>
    %17 = math.exp %16 : vector<8x784xf32>
    %cst_12 = arith.constant 1.000000e+00 : f32
    %18 = vector.broadcast %cst_12 : f32 to vector<8x784xf32>
    %19 = arith.addf %18, %17 : vector<8x784xf32>
    %20 = tpu.reciprocal %19 : vector<8x784xf32> -> vector<8x784xf32>
    %c0_13 = arith.constant 0 : index
    %c0_14 = arith.constant 0 : index
    %21 = vector.load %arg6[%c0_13, %c0_14] : memref<8x784xf32, #tpu.memory_space<vmem>>, vector<8x784xf32>
    tpu.vector_store %arg6[%c0_13, %c0_14], %20 {strides = array<i32>} : memref<8x784xf32, #tpu.memory_space<vmem>>, vector<8x784xf32>,
    return
  }
  func.func @transform_0(%arg0: i32) -> (i32, i32) {
    %c0_i32 = arith.constant 0 : i32
    %c0_i32_0 = arith.constant 0 : i32
    return %arg0, %c0_i32 : i32, i32
  }
  func.func @transform_1(%arg0: i32) -> (i32, i32) {
    %c0_i32 = arith.constant 0 : i32
    %c0_i32_0 = arith.constant 0 : i32
    %c0_i32_1 = arith.constant 0 : i32
    return %c0_i32, %c0_i32_0 : i32, i32
  }
  func.func @transform_2(%arg0: i32) -> (i32, i32) {
    %c0_i32 = arith.constant 0 : i32
    %c0_i32_0 = arith.constant 0 : i32
    %c0_i32_1 = arith.constant 0 : i32
    return %c0_i32, %c0_i32_0 : i32, i32
  }
  func.func @transform_3(%arg0: i32) -> (i32, i32) {
    %c0_i32 = arith.constant 0 : i32
    %c0_i32_0 = arith.constant 0 : i32
    %c0_i32_1 = arith.constant 0 : i32
    return %c0_i32, %c0_i32_0 : i32, i32
  }
  func.func @transform_4(%arg0: i32) -> (i32, i32) {
    %c0_i32 = arith.constant 0 : i32
    %c0_i32_0 = arith.constant 0 : i32
    %c0_i32_1 = arith.constant 0 : i32
    return %c0_i32, %c0_i32_0 : i32, i32
  }
  func.func @transform_5(%arg0: i32) -> (i32, i32) {
    %c0_i32 = arith.constant 0 : i32
    %c0_i32_0 = arith.constant 0 : i32
    return %arg0, %c0_i32 : i32, i32
  }
}

</mosaic_0001>

<bundles_post_ra>
// kernel: net_forward.1
= control target key start
LH: loop header
LB: loop body
LE: loop exit
PB: predicated region body
PF: predicated region fallthrough
CT: control target
= control target key end

     0   :  { %vm629_vm0 = vcmask 130048   ;;  %s4351_s1 = inlined_call_operand.vmem [shape: bf16[784,256], index: 1, kind: input, shape index: {}]   ;;  %s4352_s0 = inlined_call_operand.vmem [shape: f32[8,784], index: 0, kind: input, shape index: {}]   ;;  %s4353_s3 = inlined_call_operand.vmem [shape: bf16[256,784], index: 3, kind: input, shape index: {}]   ;;  %s4354_s2 = inlined_call_operand.vmem [shape: f32[1,256], index: 2, kind: input, shape index: {}]   ;;  %s4355_s4 = inlined_call_operand.vmem [shape: f32[1,784], index: 4, kind: input, shape index: {}]   ;;  %s4356_s5 = inlined_call_operand.vmem [shape: f32[8,784], index: 5, kind: output, shape index: {}]  }
   0x1   :  { %v1916_v0 = vld [vmem:[%s4351_s1 + $0x70] sm:$0xf]  ;;  %v2715_v1 = vld [vmem:[%s4351_s1 + $0x74] sm:$0xf0]  ;;  %v1908_v11 = vld [vmem:[%s4351_s1 + $0x60] sm:$0xf] }
   0x2   :  { %v2044_v2 = vld [vmem:[%s4351_s1 + $0x170] sm:$0xf]  ;;  %v1917_v3 = vor.u32 %v2715_v1, %v1916_v0  ;;  %v2747_v4 = vld [vmem:[%s4351_s1 + $0x174] sm:$0xf0]  ;;  %v2713_v13 = vld [vmem:[%s4351_s1 + $0x64] sm:$0xf0] }
   0x3   :  { %v2108_v5 = vld [vmem:[%s4351_s1 + $0x1f0] sm:$0xf]  ;;  %v2763_v6 = vld [vmem:[%s4351_s1 + $0x1f4] sm:$0xf0]  ;;  %v2045_v7 = vor.u32 %v2747_v4, %v2044_v2  ;;  %v2036_v14 = vld [vmem:[%s4351_s1 + $0x160] sm:$0xf]  ;;  %v1909_v16 = vor.u32 %v2713_v13, %v1908_v11 }
   0x4   :  { %v2109_v8 = vor.u32 %v2763_v6, %v2108_v5  ;;  %v1980_v9 = vld [vmem:[%s4351_s1 + $0xf0] sm:$0xf]  ;;  %v2731_v10 = vld [vmem:[%s4351_s1 + $0xf4] sm:$0xf0]  ;;  %633 = vmatpush.bf16.msra.mxu0 %v1917_v3  ;;  %v2745_v15 = vld [vmem:[%s4351_s1 + $0x164] sm:$0xf0] }
   0x5   :  { %v1981_v12 = vor.u32 %v2731_v10, %v1980_v9  ;;  %659 = vmatpush.bf16.msra.mxu2 %v2045_v7  ;;  %v2037_v17 = vor.u32 %v2745_v15, %v2036_v14  ;;  %v2100_v18 = vld [vmem:[%s4351_s1 + $0x1e0] sm:$0xf]  ;;  %v2761_v19 = vld [vmem:[%s4351_s1 + $0x1e4] sm:$0xf0]  ;;  %v1900_v23 = vld [vmem:[%s4351_s1 + $0x50] sm:$0xf] }
   0x6   :  { %672 = vmatpush.bf16.msra.mxu3 %v2109_v8  ;;  %v1972_v20 = vld [vmem:[%s4351_s1 + $0xe0] sm:$0xf]  ;;  %v2101_v21 = vor.u32 %v2761_v19, %v2100_v18  ;;  %v2729_v22 = vld [vmem:[%s4351_s1 + $0xe4] sm:$0xf0]  ;;  %v2711_v24 = vld [vmem:[%s4351_s1 + $0x54] sm:$0xf0] }
   0x7   :  { %646 = vmatpush.bf16.msra.mxu1 %v1981_v12  ;;  %v1973_v25 = vor.u32 %v2729_v22, %v1972_v20  ;;  %v2028_v26 = vld [vmem:[%s4351_s1 + $0x150] sm:$0xf]  ;;  %v2743_v27 = vld [vmem:[%s4351_s1 + $0x154] sm:$0xf0]  ;;  %v1901_v29 = vor.u32 %v2711_v24, %v1900_v23  ;;  %v1892_v35 = vld [vmem:[%s4351_s1 + $0x40] sm:$0xf] }
   0x8   :  { %v2092_v28 = vld [vmem:[%s4351_s1 + $0x1d0] sm:$0xf]  ;;  %634 = vmatpush.bf16.msra.mxu0 %v1909_v16  ;;  %v2759_v30 = vld [vmem:[%s4351_s1 + $0x1d4] sm:$0xf0]  ;;  %v2029_v33 = vor.u32 %v2743_v27, %v2028_v26  ;;  %v2709_v36 = vld [vmem:[%s4351_s1 + $0x44] sm:$0xf0] }
   0x9   :  { %v1964_v31 = vld [vmem:[%s4351_s1 + $0xd0] sm:$0xf]  ;;  %v2727_v32 = vld [vmem:[%s4351_s1 + $0xd4] sm:$0xf0]  ;;  %660 = vmatpush.bf16.msra.mxu2 %v2037_v17  ;;  %v2093_v34 = vor.u32 %v2759_v30, %v2092_v28  ;;  %v2020_v37 = vld [vmem:[%s4351_s1 + $0x140] sm:$0xf]  ;;  %v1893_v44 = vor.u32 %v2709_v36, %v1892_v35 }
   0xa   :  { %673 = vmatpush.bf16.msra.mxu3 %v2101_v21  ;;  %v1965_v38 = vor.u32 %v2727_v32, %v1964_v31  ;;  %v2741_v39 = vld [vmem:[%s4351_s1 + $0x144] sm:$0xf0]  ;;  %v2084_v40 = vld [vmem:[%s4351_s1 + $0x1c0] sm:$0xf]  ;;  %v1884_v47 = vld [vmem:[%s4351_s1 + $0x30] sm:$0xf] }
   0xb   :  { %647 = vmatpush.bf16.msra.mxu1 %v1973_v25  ;;  %v2757_v41 = vld [vmem:[%s4351_s1 + $0x1c4] sm:$0xf0]  ;;  %v1956_v42 = vld [vmem:[%s4351_s1 + $0xc0] sm:$0xf]  ;;  %v2021_v45 = vor.u32 %v2741_v39, %v2020_v37  ;;  %v2707_v48 = vld [vmem:[%s4351_s1 + $0x34] sm:$0xf0] }
   0xc   :  { %v2725_v43 = vld [vmem:[%s4351_s1 + $0xc4] sm:$0xf0]  ;;  %635 = vmatpush.bf16.msra.mxu0 %v1901_v29  ;;  %v2085_v46 = vor.u32 %v2757_v41, %v2084_v40  ;;  %v2012_v49 = vld [vmem:[%s4351_s1 + $0x130] sm:$0xf]  ;;  %v2739_v51 = vld [vmem:[%s4351_s1 + $0x134] sm:$0xf0]  ;;  %v1885_v56 = vor.u32 %v2707_v48, %v1884_v47 }
   0xd   :  { %661 = vmatpush.bf16.msra.mxu2 %v2029_v33  ;;  %v1957_v50 = vor.u32 %v2725_v43, %v1956_v42  ;;  %v2076_v52 = vld [vmem:[%s4351_s1 + $0x1b0] sm:$0xf]  ;;  %v2755_v53 = vld [vmem:[%s4351_s1 + $0x1b4] sm:$0xf0]  ;;  %v2013_v57 = vor.u32 %v2739_v51, %v2012_v49  ;;  %v1876_v59 = vld [vmem:[%s4351_s1 + $0x20] sm:$0xf] }
   0xe   :  { %674 = vmatpush.bf16.msra.mxu3 %v2093_v34  ;;  %v1948_v54 = vld [vmem:[%s4351_s1 + $0xb0] sm:$0xf]  ;;  %v2723_v55 = vld [vmem:[%s4351_s1 + $0xb4] sm:$0xf0]  ;;  %v2077_v58 = vor.u32 %v2755_v53, %v2076_v52  ;;  %v2705_v60 = vld [vmem:[%s4351_s1 + $0x24] sm:$0xf0] }
   0xf   :  { %648 = vmatpush.bf16.msra.mxu1 %v1965_v38  ;;  %v2004_v61 = vld [vmem:[%s4351_s1 + $0x120] sm:$0xf]  ;;  %v1949_v62 = vor.u32 %v2723_v55, %v1948_v54  ;;  %v2737_v63 = vld [vmem:[%s4351_s1 + $0x124] sm:$0xf0]  ;;  %v1877_v4 = vor.u32 %v2705_v60, %v1876_v59  ;;  %v1868_v7 = vld [vmem:[%s4351_s1 + $0x10] sm:$0xf] }
  0x10   :  { %636 = vmatpush.bf16.msra.mxu0 %v1893_v44  ;;  %v2068_v0 = vld [vmem:[%s4351_s1 + $0x1a0] sm:$0xf]  ;;  %v2753_v1 = vld [vmem:[%s4351_s1 + $0x1a4] sm:$0xf0]  ;;  %v2005_v5 = vor.u32 %v2737_v63, %v2004_v61  ;;  %v2703_v8 = vld [vmem:[%s4351_s1 + $0x14] sm:$0xf0] }
  0x11   :  { %662 = vmatpush.bf16.msra.mxu2 %v2021_v45  ;;  %v1940_v2 = vld [vmem:[%s4351_s1 + $0xa0] sm:$0xf]  ;;  %v2721_v3 = vld [vmem:[%s4351_s1 + $0xa4] sm:$0xf0]  ;;  %v2069_v6 = vor.u32 %v2753_v1, %v2068_v0  ;;  %v1996_v9 = vld [vmem:[%s4351_s1 + $0x110] sm:$0xf]  ;;  %v1869_v16 = vor.u32 %v2703_v8, %v1868_v7 }
  0x12   :  { %675 = vmatpush.bf16.msra.mxu3 %v2085_v46  ;;  %v1941_v10 = vor.u32 %v2721_v3, %v1940_v2  ;;  %v2735_v11 = vld [vmem:[%s4351_s1 + $0x114] sm:$0xf0]  ;;  %v2060_v12 = vld [vmem:[%s4351_s1 + $0x190] sm:$0xf]  ;;  %v1860_v17 = vld [vmem:[%s4351_s1] sm:$0xf] }
  0x13   :  { %649 = vmatpush.bf16.msra.mxu1 %v1957_v50  ;;  %v2751_v13 = vld [vmem:[%s4351_s1 + $0x194] sm:$0xf0]  ;;  %v1932_v14 = vld [vmem:[%s4351_s1 + $0x90] sm:$0xf]  ;;  %v2701_v18 = vld [vmem:[%s4351_s1 + $0x4] sm:$0xf0]  ;;  %v1997_v20 = vor.u32 %v2735_v11, %v1996_v9 }
  0x14   :  { %637 = vmatpush.bf16.msra.mxu0 %v1885_v56  ;;  %v2719_v15 = vld [vmem:[%s4351_s1 + $0x94] sm:$0xf0]  ;;  %v1988_v19 = vld [vmem:[%s4351_s1 + $0x100] sm:$0xf]  ;;  %v2061_v21 = vor.u32 %v2751_v13, %v2060_v12  ;;  %v2733_v22 = vld [vmem:[%s4351_s1 + $0x104] sm:$0xf0]  ;;  %v1861_v32 = vor.u32 %v2701_v18, %v1860_v17 }
  0x15   :  { %663 = vmatpush.bf16.msra.mxu2 %v2013_v57  ;;  %v2052_v23 = vld [vmem:[%s4351_s1 + $0x180] sm:$0xf]  ;;  %v2749_v24 = vld [vmem:[%s4351_s1 + $0x184] sm:$0xf0]  ;;  %v1933_v25 = vor.u32 %v2719_v15, %v1932_v14  ;;  %v2172_v26 = vld [vmem:[%s4351_s1 + $0x270] sm:$0xf]  ;;  %v1989_v36 = vor.u32 %v2733_v22, %v1988_v19 }
  0x16   :  { %676 = vmatpush.bf16.msra.mxu3 %v2077_v58  ;;  %v2779_v27 = vld [vmem:[%s4351_s1 + $0x274] sm:$0xf0]  ;;  %v2714_v28 = vld [vmem:[%s4351_s1 + $0x74] sm:$0xf]  ;;  %v1918_v29 = vld [vmem:[%s4351_s1 + $0x78] sm:$0xf0]  ;;  %v2053_v37 = vor.u32 %v2749_v24, %v2052_v23 }
  0x17   :  { %650 = vmatpush.bf16.msra.mxu1 %v1949_v62  ;;  %v1924_v30 = vld [vmem:[%s4351_s1 + $0x80] sm:$0xf]  ;;  %v2717_v31 = vld [vmem:[%s4351_s1 + $0x84] sm:$0xf0]  ;;  %v23_v33 = vld [vmem:[%s4352_s0 + $0x10] sm:$0xff]  ;;  %v2173_v41 = vor.u32 %v2779_v27, %v2172_v26  ;;  %v1921_v42 = vor.u32 %v2714_v28, %v1918_v29 }
  0x18   :  { %638 = vmatpush.bf16.msra.mxu0 %v1877_v4  ;;  %v2244_v34 = vld [vmem:[%s4351_s1 + $0x300] sm:$0xf]  ;;  %v2797_v35 = vld [vmem:[%s4351_s1 + $0x304] sm:$0xf0]  ;;  %v2236_v38 = vld [vmem:[%s4351_s1 + $0x2f0] sm:$0xf]  ;;  %v1925_v46 = vor.u32 %v2717_v31, %v1924_v30  ;;  %v3208_v51 = vpack.c.bf16 %v23_v33, %v23_v33 }
  0x19   :  { %664 = vmatpush.bf16.msra.mxu2 %v2005_v5  ;;  %v2795_v39 = vld [vmem:[%s4351_s1 + $0x2f4] sm:$0xf0]  ;;  %v2730_v40 = vld [vmem:[%s4351_s1 + $0xf4] sm:$0xf]  ;;  %v1982_v43 = vld [vmem:[%s4351_s1 + $0xf8] sm:$0xf0]  ;;  %v2245_v47 = vor.u32 %v2797_v35, %v2244_v34 }
  0x1a   :  { %677 = vmatpush.bf16.msra.mxu3 %v2069_v6  ;;  %v2164_v44 = vld [vmem:[%s4351_s1 + $0x260] sm:$0xf]  ;;  %v2777_v48 = vld [vmem:[%s4351_s1 + $0x264] sm:$0xf0]  ;;  %v2712_v49 = vld [vmem:[%s4351_s1 + $0x64] sm:$0xf]  ;;  %v2237_v52 = vor.u32 %v2795_v39, %v2236_v38  ;;  %v1985_v55 = vor.u32 %v2730_v40, %v1982_v43 }
  0x1b   :  { %651 = vmatpush.bf16.msra.mxu1 %v1941_v10  ;;  %v21_v45 = vld [vmem:[%s4352_s0] sm:$0xff]  ;;  %v1910_v50 = vld [vmem:[%s4351_s1 + $0x68] sm:$0xf0]  ;;  %v24_v53 = vld [vmem:[%s4352_s0 + $0x18] sm:$0xff]  ;;  %v2165_v59 = vor.u32 %v2777_v48, %v2164_v44 }
  0x1c   :  { %639 = vmatpush.bf16.msra.mxu0 %v1869_v16  ;;  %v22_v54 = vld [vmem:[%s4352_s0 + $0x8] sm:$0xff]  ;;  %v2228_v56 = vld [vmem:[%s4351_s1 + $0x2e0] sm:$0xf]  ;;  %v3222_v58 = vpack.c.bf16 %v21_v45, %v21_v45  ;;  %v1913_v60 = vor.u32 %v2712_v49, %v1910_v50  ;;  %v2728_v61 = vld [vmem:[%s4351_s1 + $0xe4] sm:$0xf]  ;;  %v3242_v3 = vpack.c.bf16 %v24_v53, %v24_v53 }
  0x1d   :  { %665 = vmatpush.bf16.msra.mxu2 %v1997_v20  ;;  %v2793_v57 = vld [vmem:[%s4351_s1 + $0x2e4] sm:$0xf0]  ;;  %v1974_v62 = vld [vmem:[%s4351_s1 + $0xe8] sm:$0xf0]  ;;  %v2156_v63 = vld [vmem:[%s4351_s1 + $0x250] sm:$0xf]  ;;  %v3244_v4 = vpack.c.bf16 %v22_v54, %v22_v54 }
  0x1e   :  { %678 = vmatpush.bf16.msra.mxu3 %v2061_v21  ;;  %v2775_v0 = vld [vmem:[%s4351_s1 + $0x254] sm:$0xf0]  ;;  %v2710_v1 = vld [vmem:[%s4351_s1 + $0x54] sm:$0xf]  ;;  %v1902_v2 = vld [vmem:[%s4351_s1 + $0x58] sm:$0xf0]  ;;  %v2229_v5 = vor.u32 %v2793_v57, %v2228_v56  ;;  %v1977_v6 = vor.u32 %v2728_v61, %v1974_v62 }
  0x1f   :  { %652 = vmatpush.bf16.msra.mxu1 %v1933_v25  ;;  %v2220_v7 = vld [vmem:[%s4351_s1 + $0x2d0] sm:$0xf]  ;;  %v2791_v8 = vld [vmem:[%s4351_s1 + $0x2d4] sm:$0xf0]  ;;  %v2157_v9 = vor.u32 %v2775_v0, %v2156_v63  ;;  %v1905_v10 = vor.u32 %v2710_v1, %v1902_v2  ;;  %v2726_v11 = vld [vmem:[%s4351_s1 + $0xd4] sm:$0xf] }
  0x20   :  { %640 = vmatpush.bf16.msra.mxu0 %v1861_v32  ;;  %v1966_v12 = vld [vmem:[%s4351_s1 + $0xd8] sm:$0xf0]  ;;  %v2148_v13 = vld [vmem:[%s4351_s1 + $0x240] sm:$0xf]  ;;  %v2773_v14 = vld [vmem:[%s4351_s1 + $0x244] sm:$0xf0]  ;;  %v2221_v17 = vor.u32 %v2791_v8, %v2220_v7 }
  0x21   :  { %666 = vmatpush.bf16.msra.mxu2 %v1989_v36  ;;  %v2708_v15 = vld [vmem:[%s4351_s1 + $0x44] sm:$0xf]  ;;  %v1894_v16 = vld [vmem:[%s4351_s1 + $0x48] sm:$0xf0]  ;;  %v1969_v18 = vor.u32 %v2726_v11, %v1966_v12  ;;  %v2212_v19 = vld [vmem:[%s4351_s1 + $0x2c0] sm:$0xf]  ;;  %v2149_v21 = vor.u32 %v2773_v14, %v2148_v13 }
  0x22   :  { %679 = vmatpush.bf16.msra.mxu3 %v2053_v37  ;;  %v2789_v20 = vld [vmem:[%s4351_s1 + $0x2c4] sm:$0xf0]  ;;  %v1897_v22 = vor.u32 %v2708_v15, %v1894_v16  ;;  %v2724_v23 = vld [vmem:[%s4351_s1 + $0xc4] sm:$0xf]  ;;  %v1958_v24 = vld [vmem:[%s4351_s1 + $0xc8] sm:$0xf0] }
  0x23   :  { %653 = vmatpush.bf16.msra.mxu1 %v1925_v46  ;;  %641 = vmatmul.bf16.vlgmr.msra.gmra.mxu0 %v3222_v58  ;;  %v2140_v25 = vld [vmem:[%s4351_s1 + $0x230] sm:$0xf]  ;;  %v2771_v26 = vld [vmem:[%s4351_s1 + $0x234] sm:$0xf0]  ;;  %v2706_v27 = vld [vmem:[%s4351_s1 + $0x34] sm:$0xf]  ;;  %v2213_v29 = vor.u32 %v2789_v20, %v2212_v19  ;;  %v1961_v30 = vor.u32 %v2724_v23, %v1958_v24 }
  0x24   :  { %685 = vmatpush.bf16.msrb.mxu0 %v2173_v41  ;;  %667 = vmatmul.bf16.vlgmr.msra.gmra.mxu2 %v3208_v51  ;;  %v1886_v28 = vld [vmem:[%s4351_s1 + $0x38] sm:$0xf0]  ;;  %v2204_v31 = vld [vmem:[%s4351_s1 + $0x2b0] sm:$0xf]  ;;  %v2787_v32 = vld [vmem:[%s4351_s1 + $0x2b4] sm:$0xf0]  ;;  %v2141_v34 = vor.u32 %v2771_v26, %v2140_v25 }
  0x25   :  { %718 = vmatpush.bf16.msrb.mxu2 %v2245_v47  ;;  %680 = vmatmul.bf16.vlgmr.msra.gmra.mxu3 %v3242_v3  ;;  %v27_v33 = vld [vmem:[%s4352_s0 + $0x30] sm:$0xff]  ;;  %v1889_v35 = vor.u32 %v2706_v27, %v1886_v28  ;;  %v1950_v37 = vld [vmem:[%s4351_s1 + $0xb8] sm:$0xf0]  ;;  %v2132_v38 = vld [vmem:[%s4351_s1 + $0x220] sm:$0xf] }
  0x26   :  { %724 = vmatpush.bf16.msrb.mxu3 %v1921_v42  ;;  %654 = vmatmul.bf16.vlgmr.msra.gmra.mxu1 %v3244_v4  ;;  %v2722_v36 = vld [vmem:[%s4351_s1 + $0xb4] sm:$0xf]  ;;  %v2769_v39 = vld [vmem:[%s4351_s1 + $0x224] sm:$0xf0]  ;;  %v2704_v40 = vld [vmem:[%s4351_s1 + $0x24] sm:$0xf]  ;;  %v2205_v42 = vor.u32 %v2787_v32, %v2204_v31  ;;  %v3325_v43 = vpack.c.bf16 %v27_v33, %v27_v33 }
  0x27   :  { %698 = vmatpush.bf16.msrb.mxu1 %v2237_v52  ;;  %v1878_v41 = vld [vmem:[%s4351_s1 + $0x28] sm:$0xf0]  ;;  %v1953_v44 = vor.u32 %v2722_v36, %v1950_v37  ;;  %v2196_v45 = vld [vmem:[%s4351_s1 + $0x2a0] sm:$0xf]  ;;  %v2785_v46 = vld [vmem:[%s4351_s1 + $0x2a4] sm:$0xf0]  ;;  %v2133_v47 = vor.u32 %v2769_v39, %v2132_v38 }
  0x28   :  { %686 = vmatpush.bf16.msrb.mxu0 %v2165_v59  ;;  %v1881_v48 = vor.u32 %v2704_v40, %v1878_v41  ;;  %v2720_v49 = vld [vmem:[%s4351_s1 + $0xa4] sm:$0xf]  ;;  %v1942_v50 = vld [vmem:[%s4351_s1 + $0xa8] sm:$0xf0]  ;;  %v2124_v52 = vld [vmem:[%s4351_s1 + $0x210] sm:$0xf]  ;;  %v2197_v56 = vor.u32 %v2785_v46, %v2196_v45 }
  0x29   :  { %737 = vmatpush.bf16.msra.mxu2 %v1985_v55  ;;  %v2767_v53 = vld [vmem:[%s4351_s1 + $0x214] sm:$0xf0]  ;;  %v2702_v54 = vld [vmem:[%s4351_s1 + $0x14] sm:$0xf]  ;;  %v1870_v55 = vld [vmem:[%s4351_s1 + $0x18] sm:$0xf0]  ;;  %v1945_v57 = vor.u32 %v2720_v49, %v1942_v50 }
  0x2a   :  { %725 = vmatpush.bf16.msrb.mxu3 %v1913_v60  ;;  %v2188_v59 = vld [vmem:[%s4351_s1 + $0x290] sm:$0xf]  ;;  %v2783_v60 = vld [vmem:[%s4351_s1 + $0x294] sm:$0xf0]  ;;  %v2718_v61 = vld [vmem:[%s4351_s1 + $0x94] sm:$0xf]  ;;  %v2125_v62 = vor.u32 %v2767_v53, %v2124_v52  ;;  %v1873_v63 = vor.u32 %v2702_v54, %v1870_v55 }
  0x2b   :  { %699 = vmatpush.bf16.msrb.mxu1 %v2229_v5  ;;  %v1934_v0 = vld [vmem:[%s4351_s1 + $0x98] sm:$0xf0]  ;;  %v2116_v1 = vld [vmem:[%s4351_s1 + $0x200] sm:$0xf]  ;;  %v2765_v2 = vld [vmem:[%s4351_s1 + $0x204] sm:$0xf0]  ;;  %v2189_v8 = vor.u32 %v2783_v60, %v2188_v59 }
  0x2c   :  { %687 = vmatpush.bf16.msrb.mxu0 %v2157_v9  ;;  %v2700_v5 = vld [vmem:[%s4351_s1 + $0x4] sm:$0xf]  ;;  %v2746_v7 = vld [vmem:[%s4351_s1 + $0x174] sm:$0xf]  ;;  %v2046_v9 = vld [vmem:[%s4351_s1 + $0x178] sm:$0xf0]  ;;  %v1937_v12 = vor.u32 %v2718_v61, %v1934_v0  ;;  %v2117_v16 = vor.u32 %v2765_v2, %v2116_v1 }
  0x2d   :  { %738 = vmatpush.bf16.msra.mxu2 %v1977_v6  ;;  %v1862_v6 = vld [vmem:[%s4351_s1 + $0x8] sm:$0xf0]  ;;  %v2174_v11 = vld [vmem:[%s4351_s1 + $0x278] sm:$0xf0]  ;;  %v2180_v13 = vld [vmem:[%s4351_s1 + $0x280] sm:$0xf] }
  0x2e   :  { %726 = vmatpush.bf16.msrb.mxu3 %v1905_v10  ;;  %v2778_v10 = vld [vmem:[%s4351_s1 + $0x274] sm:$0xf]  ;;  %v2781_v14 = vld [vmem:[%s4351_s1 + $0x284] sm:$0xf0]  ;;  %v25_v15 = vld [vmem:[%s4352_s0 + $0x20] sm:$0xff] }
  0x2f   :  { %700 = vmatpush.bf16.msrb.mxu1 %v2221_v17  ;;  %v1865_v17 = vor.u32 %v2700_v5, %v1862_v6  ;;  %v1926_v19 = vld [vmem:[%s4351_s1 + $0x88] sm:$0xf0]  ;;  %v2762_v20 = vld [vmem:[%s4351_s1 + $0x1f4] sm:$0xf]  ;;  %v2110_v23 = vld [vmem:[%s4351_s1 + $0x1f8] sm:$0xf0]  ;;  %v2181_v26 = vor.u32 %v2781_v14, %v2180_v13 }
  0x30   :  { %688 = vmatpush.bf16.msrb.mxu0 %v2149_v21  ;;  %v2049_v21 = vor.u32 %v2746_v7, %v2046_v9  ;;  %v2794_v24 = vld [vmem:[%s4351_s1 + $0x2f4] sm:$0xf]  ;;  %v2238_v25 = vld [vmem:[%s4351_s1 + $0x2f8] sm:$0xf0]  ;;  %v26_v27 = vld [vmem:[%s4352_s0 + $0x28] sm:$0xff] }
  0x31   :  { %739 = vmatpush.bf16.msra.mxu2 %v1969_v18  ;;  %v2716_v18 = vld [vmem:[%s4351_s1 + $0x84] sm:$0xf]  ;;  %v2166_v33 = vld [vmem:[%s4351_s1 + $0x268] sm:$0xf0]  ;;  %v3436_v37 = vpack.c.bf16 %v26_v27, %v26_v27  ;;  %v2030_v45 = vld [vmem:[%s4351_s1 + $0x158] sm:$0xf0] }
  0x32   :  { %727 = vmatpush.bf16.msrb.mxu3 %v1897_v22  ;;  %v2177_v22 = vor.u32 %v2778_v10, %v2174_v11  ;;  %v2744_v28 = vld [vmem:[%s4351_s1 + $0x164] sm:$0xf]  ;;  %v1929_v31 = vor.u32 %v2716_v18, %v1926_v19  ;;  %v2102_v39 = vld [vmem:[%s4351_s1 + $0x1e8] sm:$0xf0]  ;;  %v2774_v46 = vld [vmem:[%s4351_s1 + $0x254] sm:$0xf] }
  0x33   :  { %701 = vmatpush.bf16.msrb.mxu1 %v2213_v29  ;;  %v2038_v29 = vld [vmem:[%s4351_s1 + $0x168] sm:$0xf0]  ;;  %v2776_v32 = vld [vmem:[%s4351_s1 + $0x264] sm:$0xf]  ;;  %v2758_v50 = vld [vmem:[%s4351_s1 + $0x1d4] sm:$0xf] }
  0x34   :  { %689 = vmatpush.bf16.msrb.mxu0 %v2141_v34  ;;  %2250 = vmatmul.msk.bf16.vlgmr.msrb.gmra.mxu2 %vm629_vm0, %v3325_v43  ;;  %v2113_v34 = vor.u32 %v2762_v20, %v2110_v23  ;;  %v2760_v36 = vld [vmem:[%s4351_s1 + $0x1e4] sm:$0xf]  ;;  %v2041_v38 = vor.u32 %v2744_v28, %v2038_v29  ;;  %v2230_v41 = vld [vmem:[%s4351_s1 + $0x2e8] sm:$0xf0]  ;;  %v2094_v53 = vld [vmem:[%s4351_s1 + $0x1d8] sm:$0xf0] }
  0x35   :  { %740 = vmatpush.bf16.msra.mxu2 %v1961_v30  ;;  %v3425_v30 = vpack.c.bf16 %v25_v15, %v25_v15  ;;  %v2792_v40 = vld [vmem:[%s4351_s1 + $0x2e4] sm:$0xf]  ;;  %v2790_v54 = vld [vmem:[%s4351_s1 + $0x2d4] sm:$0xf]  ;;  %v2222_v55 = vld [vmem:[%s4351_s1 + $0x2d8] sm:$0xf0] }
  0x36   :  { %728 = vmatpush.bf16.msrb.mxu3 %v1889_v35  ;;  %v2241_v35 = vor.u32 %v2794_v24, %v2238_v25  ;;  %v2233_v49 = vor.u32 %v2792_v40, %v2230_v41  ;;  %v2022_v59 = vld [vmem:[%s4351_s1 + $0x148] sm:$0xf0]  ;;  %v2772_v60 = vld [vmem:[%s4351_s1 + $0x244] sm:$0xf]  ;;  %v2738_v6 = vld [vmem:[%s4351_s1 + $0x134] sm:$0xf] }
  0x37   :  { %702 = vmatpush.bf16.msrb.mxu1 %v2205_v42  ;;  %v2169_v42 = vor.u32 %v2776_v32, %v2166_v33  ;;  %v2150_v61 = vld [vmem:[%s4351_s1 + $0x248] sm:$0xf0]  ;;  %v2756_v0 = vld [vmem:[%s4351_s1 + $0x1c4] sm:$0xf]  ;;  %v2014_v7 = vld [vmem:[%s4351_s1 + $0x138] sm:$0xf0] }
  0x38   :  { %690 = vmatpush.bf16.msrb.mxu0 %v2133_v47  ;;  %v2158_v47 = vld [vmem:[%s4351_s1 + $0x258] sm:$0xf0]  ;;  %v2086_v1 = vld [vmem:[%s4351_s1 + $0x1c8] sm:$0xf0]  ;;  %v2788_v2 = vld [vmem:[%s4351_s1 + $0x2c4] sm:$0xf]  ;;  %v2153_v5 = vor.u32 %v2772_v60, %v2150_v61  ;;  %v2017_v13 = vor.u32 %v2738_v6, %v2014_v7 }
  0x39   :  { %741 = vmatpush.bf16.msra.mxu2 %v1953_v44  ;;  %v2742_v44 = vld [vmem:[%s4351_s1 + $0x154] sm:$0xf]  ;;  %v2142_v9 = vld [vmem:[%s4351_s1 + $0x238] sm:$0xf0]  ;;  %v2089_v10 = vor.u32 %v2756_v0, %v2086_v1  ;;  %v2736_v18 = vld [vmem:[%s4351_s1 + $0x124] sm:$0xf] }
  0x3a   :  { %729 = vmatpush.bf16.msrb.mxu3 %v1881_v48  ;;  %v2105_v48 = vor.u32 %v2760_v36, %v2102_v39  ;;  %v2033_v52 = vor.u32 %v2742_v44, %v2030_v45  ;;  %v2078_v14 = vld [vmem:[%s4351_s1 + $0x1b8] sm:$0xf0]  ;;  %v2786_v15 = vld [vmem:[%s4351_s1 + $0x2b4] sm:$0xf]  ;;  %v2006_v19 = vld [vmem:[%s4351_s1 + $0x128] sm:$0xf0] }
  0x3b   :  { %703 = vmatpush.bf16.msrb.mxu1 %v2197_v56  ;;  %v2161_v56 = vor.u32 %v2774_v46, %v2158_v47  ;;  %v2768_v20 = vld [vmem:[%s4351_s1 + $0x224] sm:$0xf]  ;;  %v2009_v25 = vor.u32 %v2736_v18, %v2006_v19  ;;  %v2198_v28 = vld [vmem:[%s4351_s1 + $0x2a8] sm:$0xf0]  ;;  %v1998_v32 = vld [vmem:[%s4351_s1 + $0x118] sm:$0xf0] }
  0x3c   :  { %691 = vmatpush.bf16.msrb.mxu0 %v2125_v62  ;;  %v2097_v62 = vor.u32 %v2758_v50, %v2094_v53  ;;  %v2752_v24 = vld [vmem:[%s4351_s1 + $0x1a4] sm:$0xf]  ;;  %v2766_v33 = vld [vmem:[%s4351_s1 + $0x214] sm:$0xf]  ;;  %v2062_v40 = vld [vmem:[%s4351_s1 + $0x198] sm:$0xf0] }
  0x3d   :  { %742 = vmatpush.bf16.msra.mxu2 %v1945_v57  ;;  %v2740_v57 = vld [vmem:[%s4351_s1 + $0x144] sm:$0xf]  ;;  %v2782_v41 = vld [vmem:[%s4351_s1 + $0x294] sm:$0xf]  ;;  %v1990_v46 = vld [vmem:[%s4351_s1 + $0x108] sm:$0xf0] }
  0x3e   :  { %730 = vmatpush.bf16.msrb.mxu3 %v1873_v63  ;;  %v2225_v63 = vor.u32 %v2790_v54, %v2222_v55  ;;  %v2784_v27 = vld [vmem:[%s4351_s1 + $0x2a4] sm:$0xf]  ;;  %v2246_v50 = vld [vmem:[%s4351_s1 + $0x308] sm:$0xf0]  ;;  %v2422_v6 = vld [vmem:[%s4353_s3 + $0x150] sm:$0xf] }
  0x3f   :  { %704 = vmatpush.bf16.msrb.mxu1 %v2189_v8  ;;  %v2770_v8 = vld [vmem:[%s4351_s1 + $0x234] sm:$0xf]  ;;  %v2201_v36 = vor.u32 %v2784_v27, %v2198_v28  ;;  %v2732_v45 = vld [vmem:[%s4351_s1 + $0x104] sm:$0xf]  ;;  %v2182_v60 = vld [vmem:[%s4351_s1 + $0x288] sm:$0xf0] }
  0x40   :  { %692 = vmatpush.bf16.msrb.mxu0 %v2117_v16  ;;  %v2206_v16 = vld [vmem:[%s4351_s1 + $0x2b8] sm:$0xf0]  ;;  %v2764_v47 = vld [vmem:[%s4351_s1 + $0x204] sm:$0xf]  ;;  %v1993_v54 = vor.u32 %v2732_v45, %v1990_v46  ;;  %v2847_v0 = vld [vmem:[%s4353_s3 + $0x18c] sm:$0xf] }
  0x41   :  { %743 = vmatpush.bf16.msra.mxu2 %v1937_v12  ;;  %v2754_v12 = vld [vmem:[%s4351_s1 + $0x1b4] sm:$0xf]  ;;  %v2209_v23 = vor.u32 %v2786_v15, %v2206_v16  ;;  %v2748_v55 = vld [vmem:[%s4351_s1 + $0x184] sm:$0xf]  ;;  %v2843_v7 = vld [vmem:[%s4353_s3 + $0x168] sm:$0xf0] }
  0x42   :  { %731 = vmatpush.bf16.msrb.mxu3 %v1865_v17  ;;  %v2145_v17 = vor.u32 %v2770_v8, %v2142_v9  ;;  %v2840_v8 = vld [vmem:[%s4353_s3 + $0x154] sm:$0xf]  ;;  %v2424_v9 = vld [vmem:[%s4353_s3 + $0x16c] sm:$0xf0]  ;;  %v2829_v16 = vld [vmem:[%s4353_s3 + $0xf8] sm:$0xf0] }
  0x43   :  { %705 = vmatpush.bf16.msrb.mxu1 %v2181_v26  ;;  %693 = vmatmul.bf16.vlgmr.msrb.gmra.mxu0 %v3425_v30  ;;  %v2070_v26 = vld [vmem:[%s4351_s1 + $0x1a8] sm:$0xf0]  ;;  %v2812_v28 = vld [vmem:[%s4353_s3 + $0x74] sm:$0xf]  ;;  %v2458_v46 = vld [vmem:[%s4353_s3 + $0x190] sm:$0xf] }
  0x44   :  { %750 = vmatpush.bf16.msra.mxu0 %v2049_v21  ;;  %v2134_v21 = vld [vmem:[%s4351_s1 + $0x228] sm:$0xf0] }
  0x45   :  { %744 = vmatpush.bf16.msra.mxu2 %v1929_v31  ;;  %732 = vmatmul.bf16.vlgmr.msrb.gmra.mxu3 %v3222_v58  ;;  %v2214_v58 = vld [vmem:[%s4351_s1 + $0x2c8] sm:$0xf0]  ;;  %v2137_v29 = vor.u32 %v2768_v20, %v2134_v21  ;;  %v2734_v31 = vld [vmem:[%s4351_s1 + $0x114] sm:$0xf]  ;;  %v2338_v20 = vld [vmem:[%s4353_s3 + $0xa8] sm:$0xf] }
  0x46   :  { %776 = vmatpush.bf16.msra.mxu3 %v2177_v22  ;;  %706 = vmatmul.bf16.vlgmr.msrb.gmra.mxu1 %v3436_v37  ;;  %v2217_v11 = vor.u32 %v2788_v2, %v2214_v58  ;;  %v2081_v22 = vor.u32 %v2754_v12, %v2078_v14  ;;  %v2001_v39 = vor.u32 %v2734_v31, %v1998_v32  ;;  %v2394_v12 = vld [vmem:[%s4353_s3 + $0x118] sm:$0xf]  ;;  %v2822_v21 = vld [vmem:[%s4353_s3 + $0xc0] sm:$0xf0]  ;;  %v2815_v27 = vld [vmem:[%s4353_s3 + $0x88] sm:$0xf0] }
  0x47   :  { %763 = vmatpush.bf16.msra.mxu1 %v2113_v34  ;;  %v2126_v34 = vld [vmem:[%s4351_s1 + $0x218] sm:$0xf0] }
  0x48   :  { %751 = vmatpush.bf16.msra.mxu0 %v2041_v38  ;;  %745 = vmatmul.bf16.vlgmr.msra.gmra.mxu2 %v3244_v4  ;;  %v2025_v4 = vor.u32 %v2740_v57, %v2022_v59  ;;  %v2750_v38 = vld [vmem:[%s4351_s1 + $0x194] sm:$0xf]  ;;  %v2129_v44 = vor.u32 %v2766_v33, %v2126_v34  ;;  %v2780_v59 = vld [vmem:[%s4351_s1 + $0x284] sm:$0xf]  ;;  %v2282_v33 = vld [vmem:[%s4353_s3 + $0x38] sm:$0xf] }
  0x49   :  { %789 = vmatpush.bf16.msrb.mxu2 %v2241_v35  ;;  %v2073_v35 = vor.u32 %v2752_v24, %v2070_v26  ;;  %v2185_v2 = vor.u32 %v2780_v59, %v2182_v60  ;;  %v2339_v24 = vor.u32 %v2822_v21, %v2338_v20  ;;  %v2310_v26 = vld [vmem:[%s4353_s3 + $0x70] sm:$0xf]  ;;  %v2808_v34 = vld [vmem:[%s4353_s3 + $0x50] sm:$0xf0]  ;;  %v2402_v59 = vld [vmem:[%s4353_s3 + $0x120] sm:$0xf] }
  0x4a   :  { %777 = vmatpush.bf16.msra.mxu3 %v2169_v42  ;;  %v2190_v42 = vld [vmem:[%s4351_s1 + $0x298] sm:$0xf0]  ;;  %v2311_v31 = vor.u32 %v2815_v27, %v2310_v26  ;;  %v2816_v26 = vld [vmem:[%s4353_s3 + $0x90] sm:$0xf0] }
  0x4b   :  { %764 = vmatpush.bf16.msra.mxu1 %v2105_v48  ;;  %v2118_v48 = vld [vmem:[%s4351_s1 + $0x208] sm:$0xf0]  ;;  %v2193_v53 = vor.u32 %v2782_v41, %v2190_v42  ;;  %v2798_v42 = vld [vmem:[%s4353_s3 + $0x4] sm:$0xf]  ;;  %v2889_v27 = vld [vmem:[%s4353_s3 + $0x2dc] sm:$0xf] }
  0x4c   :  { %752 = vmatpush.bf16.msra.mxu0 %v2033_v52  ;;  %v2065_v52 = vor.u32 %v2750_v38, %v2062_v40  ;;  %v2121_v57 = vor.u32 %v2764_v47, %v2118_v48  ;;  %v2801_v40 = vld [vmem:[%s4353_s3 + $0x18] sm:$0xf0]  ;;  %v2851_v47 = vld [vmem:[%s4353_s3 + $0x1a8] sm:$0xf0]  ;;  %v2848_v48 = vld [vmem:[%s4353_s3 + $0x194] sm:$0xf] }
  0x4d   :  { %790 = vmatpush.bf16.msrb.mxu2 %v2233_v49  ;;  %v2796_v49 = vld [vmem:[%s4351_s1 + $0x304] sm:$0xf] }
  0x4e   :  { %778 = vmatpush.bf16.msra.mxu3 %v2161_v56  ;;  %v2054_v56 = vld [vmem:[%s4351_s1 + $0x188] sm:$0xf0]  ;;  %v2249_v61 = vor.u32 %v2796_v49, %v2246_v50  ;;  %v2459_v49 = vor.u32 %v2851_v47, %v2458_v46  ;;  %v2460_v50 = vld [vmem:[%s4353_s3 + $0x1ac] sm:$0xf0]  ;;  %v2806_v47 = vld [vmem:[%s4353_s3 + $0x44] sm:$0xf] }
  0x4f   :  { %765 = vmatpush.bf16.msra.mxu1 %v2097_v62  ;;  %v2450_v62 = vld [vmem:[%s4353_s3 + $0x188] sm:$0xf]  ;;  %v2057_v1 = vor.u32 %v2748_v55, %v2054_v56  ;;  %v2841_v56 = vld [vmem:[%s4353_s3 + $0x15c] sm:$0xf] }
  0x50   :  { %753 = vmatpush.bf16.msra.mxu0 %v2025_v4  ;;  %v2452_v4 = vld [vmem:[%s4353_s3 + $0x1a4] sm:$0xf0] }
  0x51   :  { %791 = vmatpush.bf16.msrb.mxu2 %v2225_v63  ;;  %v2850_v63 = vld [vmem:[%s4353_s3 + $0x1a0] sm:$0xf0] }
  0x52   :  { %779 = vmatpush.bf16.msra.mxu3 %v2153_v5  ;;  %v2451_v58 = vor.u32 %v2850_v63, %v2450_v62  ;;  %v2455_v5 = vor.u32 %v2847_v0, %v2452_v4  ;;  %v2834_v62 = vld [vmem:[%s4353_s3 + $0x124] sm:$0xf]  ;;  %v2404_v63 = vld [vmem:[%s4353_s3 + $0x13c] sm:$0xf0]  ;;  %v2674_v4 = vld [vmem:[%s4353_s3 + $0x348] sm:$0xf] }
  0x53   :  { %766 = vmatpush.bf16.msra.mxu1 %v2089_v10  ;;  %v2423_v10 = vor.u32 %v2843_v7, %v2422_v6  ;;  %v2830_v6 = vld [vmem:[%s4353_s3 + $0x100] sm:$0xf0]  ;;  %v2903_v7 = vld [vmem:[%s4353_s3 + $0x34c] sm:$0xf] }
  0x54   :  { %754 = vmatpush.bf16.msra.mxu0 %v2017_v13  ;;  %v2836_v13 = vld [vmem:[%s4353_s3 + $0x130] sm:$0xf0] }
  0x55   :  { %792 = vmatpush.bf16.msrb.mxu2 %v2217_v11  ;;  %v2427_v11 = vor.u32 %v2840_v8, %v2424_v9  ;;  %v2395_v14 = vor.u32 %v2836_v13, %v2394_v12  ;;  %v2676_v8 = vld [vmem:[%s4353_s3 + $0x364] sm:$0xf0]  ;;  %v2646_v12 = vld [vmem:[%s4353_s3 + $0x310] sm:$0xf]  ;;  %v2899_v13 = vld [vmem:[%s4353_s3 + $0x328] sm:$0xf0] }
  0x56   :  { %780 = vmatpush.bf16.msra.mxu3 %v2145_v17  ;;  %v2826_v17 = vld [vmem:[%s4353_s3 + $0xe4] sm:$0xf]  ;;  %v2679_v9 = vor.u32 %v2903_v7, %v2676_v8  ;;  %v2536_v8 = vld [vmem:[%s4353_s3 + $0x24c] sm:$0xf0] }
  0x57   :  { %767 = vmatpush.bf16.msra.mxu1 %v2081_v22  ;;  %v2819_v22 = vld [vmem:[%s4353_s3 + $0xac] sm:$0xf] }
  0x58   :  { %755 = vmatpush.bf16.msra.mxu0 %v2009_v25 }
  0x59   :  { %793 = vmatpush.bf16.msrb.mxu2 %v2209_v23  ;;  %v2340_v23 = vld [vmem:[%s4353_s3 + $0xc4] sm:$0xf0] }
  0x5a   :  { %781 = vmatpush.bf16.msra.mxu3 %v2137_v29  ;;  %v2343_v25 = vor.u32 %v2819_v22, %v2340_v23  ;;  %v2312_v29 = vld [vmem:[%s4353_s3 + $0x8c] sm:$0xf0]  ;;  %v2618_v22 = vld [vmem:[%s4353_s3 + $0x2d8] sm:$0xf]  ;;  %v2892_v23 = vld [vmem:[%s4353_s3 + $0x2f0] sm:$0xf0] }
  0x5b   :  { %768 = vmatpush.bf16.msra.mxu1 %v2073_v35  ;;  %v2315_v32 = vor.u32 %v2812_v28, %v2312_v29  ;;  %v2283_v35 = vor.u32 %v2808_v34, %v2282_v33  ;;  %v2620_v28 = vld [vmem:[%s4353_s3 + $0x2f4] sm:$0xf0] }
  0x5c   :  { %756 = vmatpush.bf16.msra.mxu0 %v2001_v39  ;;  %v2254_v39 = vld [vmem:[%s4353_s3] sm:$0xf]  ;;  %v2320_v33 = vld [vmem:[%s4353_s3 + $0x94] sm:$0xf0] }
  0x5d   :  { %794 = vmatpush.bf16.msrb.mxu2 %v2201_v36  ;;  %v2805_v36 = vld [vmem:[%s4353_s3 + $0x3c] sm:$0xf]  ;;  %v2255_v41 = vor.u32 %v2801_v40, %v2254_v39 }
  0x5e   :  { %782 = vmatpush.bf16.msra.mxu3 %v2129_v44  ;;  %v2256_v44 = vld [vmem:[%s4353_s3 + $0x1c] sm:$0xf0]  ;;  %v2809_v40 = vld [vmem:[%s4353_s3 + $0x58] sm:$0xf0] }
  0x5f   :  { %769 = vmatpush.bf16.msra.mxu1 %v2065_v52  ;;  %v2259_v45 = vor.u32 %v2798_v42, %v2256_v44  ;;  %v2463_v52 = vor.u32 %v2848_v48, %v2460_v50  ;;  %v2592_v42 = vld [vmem:[%s4353_s3 + $0x2bc] sm:$0xf0]  ;;  %v2562_v50 = vld [vmem:[%s4353_s3 + $0x268] sm:$0xf] }
  0x60   :  { %757 = vmatpush.bf16.msra.mxu0 %v1993_v54  ;;  %v2844_v54 = vld [vmem:[%s4353_s3 + $0x170] sm:$0xf0]  ;;  %v2292_v48 = vld [vmem:[%s4353_s3 + $0x5c] sm:$0xf0] }
  0x61   :  { %795 = vmatpush.bf16.msrb.mxu2 %v2193_v53  ;;  %v2430_v53 = vld [vmem:[%s4353_s3 + $0x158] sm:$0xf] }
  0x62   :  { %783 = vmatpush.bf16.msra.mxu3 %v2121_v57  ;;  %v2431_v55 = vor.u32 %v2844_v54, %v2430_v53  ;;  %v2432_v57 = vld [vmem:[%s4353_s3 + $0x174] sm:$0xf0]  ;;  %v2262_v53 = vld [vmem:[%s4353_s3 + $0x8] sm:$0xf] }
  0x63   :  { %770 = vmatpush.bf16.msra.mxu1 %v2057_v1  ;;  %758 = vmatmul.bf16.vlgmr.msra.gmra.mxu0 %v3208_v51  ;;  %v2833_v51 = vld [vmem:[%s4353_s3 + $0x11c] sm:$0xf]  ;;  %v2435_v60 = vor.u32 %v2841_v56, %v2432_v57  ;;  %v2906_v1 = vld [vmem:[%s4353_s3 + $0x360] sm:$0xf0]  ;;  %v2875_v57 = vld [vmem:[%s4353_s3 + $0x26c] sm:$0xf] }
  0x64   :  { %809 = vmatpush.bf16.msrb.mxu0 %v2249_v61  ;;  %v2837_v61 = vld [vmem:[%s4353_s3 + $0x138] sm:$0xf0]  ;;  %v2802_v56 = vld [vmem:[%s4353_s3 + $0x20] sm:$0xf0] }
  0x65   :  { %784 = vmatmul.bf16.vlgmr.msra.gmra.mxu3 %v3425_v30  ;;  %796 = vmatpush.bf16.msrb.mxu2 %v2185_v2  ;;  %v2396_v30 = vld [vmem:[%s4353_s3 + $0x134] sm:$0xf0]  ;;  %v2403_v0 = vor.u32 %v2837_v61, %v2402_v59  ;;  %v2374_v2 = vld [vmem:[%s4353_s3 + $0xe8] sm:$0xf] }
  0x66   :  { %771 = vmatmul.bf16.vlgmr.msra.gmra.mxu1 %v3242_v3  ;;  %v2399_v15 = vor.u32 %v2833_v51, %v2396_v30  ;;  %v2366_v3 = vld [vmem:[%s4353_s3 + $0xe0] sm:$0xf]  ;;  %v2375_v51 = vor.u32 %v2830_v6, %v2374_v2  ;;  %v2647_v30 = vor.u32 %v2899_v13, %v2646_v12  ;;  %v2564_v59 = vld [vmem:[%s4353_s3 + $0x284] sm:$0xf0]  ;;  %v2868_v6 = vld [vmem:[%s4353_s3 + $0x234] sm:$0xf] }
  0x67   :  { %1539 = vmatpush.bf16.msrb.mxu1 %v2451_v58  ;;  %v2367_v18 = vor.u32 %v2829_v16, %v2366_v3  ;;  %v2407_v58 = vor.u32 %v2834_v62, %v2404_v63  ;;  %v2346_v16 = vld [vmem:[%s4353_s3 + $0xb0] sm:$0xf]  ;;  %v2567_v61 = vor.u32 %v2875_v57, %v2564_v59  ;;  %v2799_v62 = vld [vmem:[%s4353_s3 + $0xc] sm:$0xf]  ;;  %v2264_v63 = vld [vmem:[%s4353_s3 + $0x24] sm:$0xf0] }
  0x68   :  { %1565 = vmatpush.bf16.msra.mxu0 %v2455_v5  ;;  %797 = vmatmul.bf16.vlgmr.msrb.gmra.mxu2 %v3436_v37  ;;  %v2368_v37 = vld [vmem:[%s4353_s3 + $0xfc] sm:$0xf0]  ;;  %v2675_v5 = vor.u32 %v2906_v1, %v2674_v4  ;;  %v2267_v4 = vor.u32 %v2799_v62, %v2264_v63  ;;  %v2506_v12 = vld [vmem:[%s4353_s3 + $0x1f8] sm:$0xf]  ;;  %v2864_v13 = vld [vmem:[%s4353_s3 + $0x210] sm:$0xf0] }
  0x69   :  { %v2371_v19 = vor.u32 %v2826_v17, %v2368_v37  ;;  %1578 = vmatpush.bf16.msra.mxu2 %v2679_v9  ;;  %v2823_v17 = vld [vmem:[%s4353_s3 + $0xc8] sm:$0xf0]  ;;  %v2849_v62 = vld [vmem:[%s4353_s3 + $0x19c] sm:$0xf] }
  0x6a   :  { %1552 = vmatpush.bf16.msrb.mxu3 %v2675_v5  ;;  %v2347_v20 = vor.u32 %v2823_v17, %v2346_v16  ;;  %v2871_v5 = vld [vmem:[%s4353_s3 + $0x248] sm:$0xf0] }
  0x6b   :  { %1540 = vmatpush.bf16.msrb.mxu1 %v2423_v10  ;;  %v2827_v10 = vld [vmem:[%s4353_s3 + $0xec] sm:$0xf] }
  0x6c   :  { %1566 = vmatpush.bf16.msra.mxu0 %v2427_v11  ;;  %v2376_v11 = vld [vmem:[%s4353_s3 + $0x104] sm:$0xf0] }
  0x6d   :  { %v2379_v3 = vor.u32 %v2827_v10, %v2376_v11  ;;  %v2539_v10 = vor.u32 %v2868_v6, %v2536_v8  ;;  %v2572_v6 = vld [vmem:[%s4353_s3 + $0x28c] sm:$0xf0] }
  0x6e   :  { %1553 = vmatpush.bf16.msrb.mxu3 %v2647_v30  ;;  %v2507_v30 = vor.u32 %v2864_v13, %v2506_v12  ;;  %v2438_v12 = vld [vmem:[%s4353_s3 + $0x160] sm:$0xf]  ;;  %v2845_v13 = vld [vmem:[%s4353_s3 + $0x178] sm:$0xf0] }
  0x6f   :  { %1541 = vmatpush.bf16.msrb.mxu1 %v2395_v14  ;;  %v2896_v14 = vld [vmem:[%s4353_s3 + $0x314] sm:$0xf] }
  0x70   :  { %1567 = vmatpush.bf16.msra.mxu0 %v2399_v15  ;;  %v2648_v15 = vld [vmem:[%s4353_s3 + $0x32c] sm:$0xf0] }
  0x71   :  { %v2651_v37 = vor.u32 %v2896_v14, %v2648_v15  ;;  %v2861_v14 = vld [vmem:[%s4353_s3 + $0x1fc] sm:$0xf]  ;;  %v2508_v15 = vld [vmem:[%s4353_s3 + $0x214] sm:$0xf0] }
  0x73   :  { %1542 = vmatpush.bf16.msrb.mxu1 %v2367_v18  ;;  %2251 = vmatmul.msk.bf16.vlgmr.msrb.gmra.mxu0 %vm629_vm0, %v3325_v43  ;;  %v2284_v43 = vld [vmem:[%s4353_s3 + $0x54] sm:$0xf0]  ;;  %v2820_v18 = vld [vmem:[%s4353_s3 + $0xb4] sm:$0xf] }
  0x74   :  { %1568 = vmatpush.bf16.msra.mxu0 %v2371_v19  ;;  %v2287_v38 = vor.u32 %v2805_v36, %v2284_v43  ;;  %v2348_v19 = vld [vmem:[%s4353_s3 + $0xcc] sm:$0xf0]  ;;  %1579 = vmatpush.bf16.msra.mxu2 %v2651_v37  ;;  %v2590_v36 = vld [vmem:[%s4353_s3 + $0x2a0] sm:$0xf]  ;;  %v2885_v43 = vld [vmem:[%s4353_s3 + $0x2b8] sm:$0xf0] }
  0x75   :  { %v2351_v21 = vor.u32 %v2820_v18, %v2348_v19  ;;  %v2591_v39 = vor.u32 %v2885_v43, %v2590_v36  ;;  %v2478_v37 = vld [vmem:[%s4353_s3 + $0x1c0] sm:$0xf]  ;;  %v2857_v18 = vld [vmem:[%s4353_s3 + $0x1d8] sm:$0xf0]  ;;  %v2854_v19 = vld [vmem:[%s4353_s3 + $0x1c4] sm:$0xf] }
  0x76   :  { %v2656_v36 = vld [vmem:[%s4353_s3 + $0x334] sm:$0xf0] }
  0x77   :  { %1543 = vmatpush.bf16.msrb.mxu1 %v2339_v24  ;;  %v2318_v24 = vld [vmem:[%s4353_s3 + $0x78] sm:$0xf] }
  0x78   :  { %1569 = vmatpush.bf16.msra.mxu0 %v2343_v25  ;;  %v2619_v25 = vor.u32 %v2892_v23, %v2618_v22  ;;  %v2319_v29 = vor.u32 %v2816_v26, %v2318_v24  ;;  %v2682_v22 = vld [vmem:[%s4353_s3 + $0x350] sm:$0xf]  ;;  %v2907_v23 = vld [vmem:[%s4353_s3 + $0x368] sm:$0xf0]  ;;  %v2904_v26 = vld [vmem:[%s4353_s3 + $0x354] sm:$0xf] }
  0x7a   :  { %1554 = vmatpush.bf16.msrb.mxu3 %v2619_v25  ;;  %v2683_v25 = vor.u32 %v2907_v23, %v2682_v22  ;;  %v2439_v22 = vor.u32 %v2845_v13, %v2438_v12  ;;  %v2270_v13 = vld [vmem:[%s4353_s3 + $0x10] sm:$0xf] }
  0x7b   :  { %1544 = vmatpush.bf16.msrb.mxu1 %v2311_v31  ;;  %v2623_v31 = vor.u32 %v2889_v27, %v2620_v28  ;;  %v2684_v28 = vld [vmem:[%s4353_s3 + $0x36c] sm:$0xf0] }
  0x7c   :  { %1570 = vmatpush.bf16.msra.mxu0 %v2315_v32  ;;  %v2813_v32 = vld [vmem:[%s4353_s3 + $0x7c] sm:$0xf] }
  0x7d   :  { %v2323_v34 = vor.u32 %v2813_v32, %v2320_v33  ;;  %1580 = vmatpush.bf16.msra.mxu2 %v2623_v31  ;;  %v2654_v32 = vld [vmem:[%s4353_s3 + $0x318] sm:$0xf]  ;;  %v2900_v33 = vld [vmem:[%s4353_s3 + $0x330] sm:$0xf0] }
  0x7e   :  { %1555 = vmatpush.bf16.msrb.mxu3 %v2591_v39  ;;  %v2626_v39 = vld [vmem:[%s4353_s3 + $0x2e0] sm:$0xf] }
  0x7f   :  { %1545 = vmatpush.bf16.msrb.mxu1 %v2283_v35 }
  0x80   :  { %1571 = vmatpush.bf16.msra.mxu0 %v2287_v38  ;;  %v2290_v38 = vld [vmem:[%s4353_s3 + $0x40] sm:$0xf] }
  0x83   :  { %1546 = vmatpush.bf16.msrb.mxu1 %v2255_v41  ;;  %v2882_v41 = vld [vmem:[%s4353_s3 + $0x2a4] sm:$0xf] }
  0x84   :  { %1572 = vmatpush.bf16.msra.mxu0 %v2259_v45  ;;  %v2291_v45 = vor.u32 %v2809_v40, %v2290_v38  ;;  %v2595_v46 = vor.u32 %v2882_v41, %v2592_v42  ;;  %v2893_v40 = vld [vmem:[%s4353_s3 + $0x2f8] sm:$0xf0]  ;;  %v2890_v42 = vld [vmem:[%s4353_s3 + $0x2e4] sm:$0xf] }
  0x85   :  { %v2627_v41 = vor.u32 %v2893_v40, %v2626_v39  ;;  %v2828_v39 = vld [vmem:[%s4353_s3 + $0xf4] sm:$0xf]  ;;  %v2384_v40 = vld [vmem:[%s4353_s3 + $0x10c] sm:$0xf0] }
  0x86   :  { %1581 = vmatpush.bf16.msra.mxu2 %v2595_v46 }
  0x87   :  { %1591 = vmatpush.bf16.msra.mxu1 %v2459_v49  ;;  %v2295_v49 = vor.u32 %v2806_v47, %v2292_v48 }
  0x88   :  { %1617 = vmatpush.bf16.msrb.mxu0 %v2463_v52  ;;  %v2878_v52 = vld [vmem:[%s4353_s3 + $0x280] sm:$0xf0] }
  0x8a   :  { %1582 = vmatpush.bf16.msra.mxu2 %v2567_v61  ;;  %v2852_v61 = vld [vmem:[%s4353_s3 + $0x1b0] sm:$0xf0] }
  0x8b   :  { %1592 = vmatpush.bf16.msra.mxu1 %v2431_v55  ;;  %v2563_v55 = vor.u32 %v2878_v52, %v2562_v50  ;;  %v2598_v50 = vld [vmem:[%s4353_s3 + $0x2a8] sm:$0xf]  ;;  %v2886_v52 = vld [vmem:[%s4353_s3 + $0x2c0] sm:$0xf0] }
  0x8c   :  { %1618 = vmatpush.bf16.msrb.mxu0 %v2435_v60  ;;  %v2263_v60 = vor.u32 %v2802_v56, %v2262_v53  ;;  %v2600_v56 = vld [vmem:[%s4353_s3 + $0x2c4] sm:$0xf0] }
  0x8d   :  { %1556 = vmatpush.bf16.msrb.mxu3 %v2563_v55  ;;  %v2883_v55 = vld [vmem:[%s4353_s3 + $0x2ac] sm:$0xf] }
  0x8e   :  { %1583 = vmatpush.bf16.msra.mxu2 %v2539_v10  ;;  %v2603_v59 = vor.u32 %v2883_v55, %v2600_v56  ;;  %v2821_v55 = vld [vmem:[%s4353_s3 + $0xbc] sm:$0xf]  ;;  %v2356_v56 = vld [vmem:[%s4353_s3 + $0xd4] sm:$0xf0] }
  0x8f   :  { %1593 = vmatpush.bf16.msra.mxu1 %v2403_v0  ;;  %v3862_v0 = vld [vmem:[%s4354_s2] sm:$0x3] }
  0x90   :  { %1619 = vmatpush.bf16.msrb.mxu0 %v2407_v58  ;;  %v2534_v58 = vld [vmem:[%s4353_s3 + $0x230] sm:$0xf]  ;;  %v135_v11 = vperm.slane %v3862_v0, 0 }
  0x91   :  { %v2535_v7 = vor.u32 %v2871_v5, %v2534_v58  ;;  %v2876_v5 = vld [vmem:[%s4353_s3 + $0x274] sm:$0xf] }
  0x92   :  { %v2575_v8 = vor.u32 %v2876_v5, %v2572_v6  ;;  %v2810_v6 = vld [vmem:[%s4353_s3 + $0x60] sm:$0xf0] }
  0x93   :  { %1594 = vmatpush.bf16.msra.mxu1 %v2375_v51  ;;  %1557 = vmatpush.bf16.msrb.mxu3 %v2535_v7 }
  0x94   :  { %1620 = vmatpush.bf16.msrb.mxu0 %v2379_v3  ;;  %v2511_v3 = vor.u32 %v2861_v14, %v2508_v15  ;;  %v2440_v14 = vld [vmem:[%s4353_s3 + $0x17c] sm:$0xf0] }
  0x96   :  { %1584 = vmatpush.bf16.msra.mxu2 %v2511_v3  ;;  %v2542_v3 = vld [vmem:[%s4353_s3 + $0x238] sm:$0xf] }
  0x97   :  { %1595 = vmatpush.bf16.msra.mxu1 %v2347_v20  ;;  %1558 = vmatpush.bf16.msrb.mxu3 %v2507_v30  ;;  %v2479_v20 = vor.u32 %v2857_v18, %v2478_v37 }
  0x98   :  { %1621 = vmatpush.bf16.msrb.mxu0 %v2351_v21  ;;  %v2480_v21 = vld [vmem:[%s4353_s3 + $0x1dc] sm:$0xf0] }
  0x99   :  { %v2483_v24 = vor.u32 %v2854_v19, %v2480_v21  ;;  %v2869_v19 = vld [vmem:[%s4353_s3 + $0x23c] sm:$0xf] }
  0x9b   :  { %1596 = vmatpush.bf16.msra.mxu1 %v2319_v29  ;;  %1559 = vmatpush.bf16.msrb.mxu3 %v2479_v20  ;;  %v2687_v29 = vor.u32 %v2904_v26, %v2684_v28  ;;  %v2544_v20 = vld [vmem:[%s4353_s3 + $0x254] sm:$0xf0]  ;;  %v2835_v26 = vld [vmem:[%s4353_s3 + $0x12c] sm:$0xf]  ;;  %v2514_v28 = vld [vmem:[%s4353_s3 + $0x200] sm:$0xf] }
  0x9c   :  { %1622 = vmatpush.bf16.msrb.mxu0 %v2323_v34  ;;  %1585 = vmatpush.bf16.msra.mxu2 %v2483_v24  ;;  %v2655_v34 = vor.u32 %v2900_v33, %v2654_v32  ;;  %v2547_v21 = vor.u32 %v2869_v19, %v2544_v20  ;;  %v2410_v24 = vld [vmem:[%s4353_s3 + $0x128] sm:$0xf]  ;;  %v2862_v32 = vld [vmem:[%s4353_s3 + $0x204] sm:$0xf]  ;;  %v2516_v33 = vld [vmem:[%s4353_s3 + $0x21c] sm:$0xf0] }
  0x9f   :  { %1597 = vmatpush.bf16.msra.mxu1 %v2291_v45  ;;  %1604 = vmatpush.bf16.msra.mxu3 %v2683_v25  ;;  %v2838_v25 = vld [vmem:[%s4353_s3 + $0x140] sm:$0xf0] }
  0xa0   :  { %v642_v35 = vpop.f32.mrf.mxu0  ;;  %1623 = vmatpush.bf16.msrb.mxu0 %v2295_v49  ;;  %1630 = vmatpush.bf16.msrb.mxu2 %v2687_v29  ;;  %v2865_v29 = vld [vmem:[%s4353_s3 + $0x218] sm:$0xf0] }
  0xa1   :  { %v643_v16 = vadd.f32 %v642_v35, %v135_v11  ;;  %v2897_v35 = vld [vmem:[%s4353_s3 + $0x31c] sm:$0xf] }
  0xa2   :  { %v2659_v38 = vor.u32 %v2897_v35, %v2656_v36  ;;  %v2411_v35 = vor.u32 %v2838_v25, %v2410_v24  ;;  %v2846_v24 = vld [vmem:[%s4353_s3 + $0x180] sm:$0xf0] }
  0xa3   :  { %v655_v44 = vpop.f32.mrf.mxu1  ;;  %1598 = vmatpush.bf16.msra.mxu1 %v2263_v60  ;;  %1605 = vmatpush.bf16.msra.mxu3 %v2655_v34  ;;  %v2466_v60 = vld [vmem:[%s4353_s3 + $0x198] sm:$0xf]  ;;  %v2519_v34 = vor.u32 %v2862_v32, %v2516_v33 }
  0xa4   :  { %1624 = vmatpush.bf16.msrb.mxu0 %v2267_v4  ;;  %v656_v27 = vadd.f32 %v655_v44, %v643_v16  ;;  %1631 = vmatpush.bf16.msrb.mxu2 %v2659_v38  ;;  %v2628_v44 = vld [vmem:[%s4353_s3 + $0x2fc] sm:$0xf0]  ;;  %v2468_v4 = vld [vmem:[%s4353_s3 + $0x1b4] sm:$0xf0]  ;;  %v2872_v16 = vld [vmem:[%s4353_s3 + $0x250] sm:$0xf0] }
  0xa5   :  { %v2631_v46 = vor.u32 %v2890_v42, %v2628_v44  ;;  %v2471_v10 = vor.u32 %v2849_v62, %v2468_v4  ;;  %v2543_v18 = vor.u32 %v2872_v16, %v2542_v3  ;;  %v2831_v38 = vld [vmem:[%s4353_s3 + $0x108] sm:$0xf0]  ;;  %v2486_v42 = vld [vmem:[%s4353_s3 + $0x1c8] sm:$0xf]  ;;  %v2858_v44 = vld [vmem:[%s4353_s3 + $0x1e0] sm:$0xf0] }
  0xa6   :  { %v2817_v62 = vld [vmem:[%s4353_s3 + $0x98] sm:$0xf0]  ;;  %v2474_v16 = vld [vmem:[%s4353_s3 + $0x1a0] sm:$0xf] }
  0xa7   :  { %v668_v54 = vpop.f32.mrf.mxu2  ;;  %1606 = vmatpush.bf16.msra.mxu3 %v2627_v41 }
  0xa8   :  { %v681_v1 = vpop.f32.mrf.mxu3  ;;  %v644_v2 = vpop.f32.mrf.mxu0  ;;  %v669_v43 = vadd.f32 %v668_v54, %v656_v27  ;;  %1632 = vmatpush.bf16.msrb.mxu2 %v2631_v46  ;;  %v2599_v54 = vor.u32 %v2886_v52, %v2598_v50  ;;  %v2412_v27 = vld [vmem:[%s4353_s3 + $0x144] sm:$0xf0]  ;;  %v2487_v46 = vor.u32 %v2858_v44, %v2486_v42  ;;  %v2387_v52 = vor.u32 %v2828_v39, %v2384_v40  ;;  %v2390_v39 = vld [vmem:[%s4353_s3 + $0xf8] sm:$0xf]  ;;  %v2832_v40 = vld [vmem:[%s4353_s3 + $0x110] sm:$0xf0] }
  0xa9   :  { %v2879_v2 = vld [vmem:[%s4353_s3 + $0x288] sm:$0xf0]  ;;  %v2415_v36 = vor.u32 %v2835_v26, %v2412_v27  ;;  %v2905_v42 = vld [vmem:[%s4353_s3 + $0x35c] sm:$0xf]  ;;  %v2692_v44 = vld [vmem:[%s4353_s3 + $0x374] sm:$0xf0] }
  0xaa   :  { %v682_v45 = vadd.f32 %v681_v1, %v669_v43  ;;  %v2570_v1 = vld [vmem:[%s4353_s3 + $0x270] sm:$0xf] }
  0xab   :  { %v657_v9 = vpop.f32.mrf.mxu1  ;;  %1607 = vmatpush.bf16.msra.mxu3 %v2599_v54  ;;  %v2571_v58 = vor.u32 %v2879_v2, %v2570_v1  ;;  %v2382_v43 = vld [vmem:[%s4353_s3 + $0xf0] sm:$0xf]  ;;  %v2824_v54 = vld [vmem:[%s4353_s3 + $0xd0] sm:$0xf0] }
  0xac   :  { %1633 = vmatpush.bf16.msrb.mxu2 %v2603_v59  ;;  %v2467_v9 = vor.u32 %v2852_v61, %v2466_v60  ;;  %v2383_v50 = vor.u32 %v2831_v38, %v2382_v43  ;;  %v2359_v60 = vor.u32 %v2821_v55, %v2356_v56  ;;  %v2326_v61 = vld [vmem:[%s4353_s3 + $0x80] sm:$0xf]  ;;  %v2908_v38 = vld [vmem:[%s4353_s3 + $0x370] sm:$0xf0]  ;;  %v2898_v55 = vld [vmem:[%s4353_s3 + $0x324] sm:$0xf] }
  0xad   :  { %v2327_v1 = vor.u32 %v2817_v62, %v2326_v61  ;;  %v2664_v56 = vld [vmem:[%s4353_s3 + $0x33c] sm:$0xf0]  ;;  %v2634_v61 = vld [vmem:[%s4353_s3 + $0x2e8] sm:$0xf] }
  0xae   :  { %v2667_v62 = vor.u32 %v2898_v55, %v2664_v56  ;;  %v2586_v55 = vld [vmem:[%s4353_s3 + $0x280] sm:$0xf]  ;;  %v2881_v56 = vld [vmem:[%s4353_s3 + $0x298] sm:$0xf0] }
  0xaf   :  { %v670_v51 = vpop.f32.mrf.mxu2  ;;  %1608 = vmatpush.bf16.msra.mxu3 %v2571_v58  ;;  %v2298_v58 = vld [vmem:[%s4353_s3 + $0x48] sm:$0xf] }
  0xb0   :  { %v683_v17 = vpop.f32.mrf.mxu3  ;;  %v2842_v51 = vld [vmem:[%s4353_s3 + $0x164] sm:$0xf]  ;;  %1634 = vmatpush.bf16.msrb.mxu2 %v2575_v8  ;;  %v2300_v8 = vld [vmem:[%s4353_s3 + $0x64] sm:$0xf0] }
  0xb1   :  { %v2443_v23 = vor.u32 %v2842_v51, %v2440_v14  ;;  %v2803_v51 = vld [vmem:[%s4353_s3 + $0x28] sm:$0xf0]  ;;  %v2800_v14 = vld [vmem:[%s4353_s3 + $0x14] sm:$0xf] }
  0xb3   :  { %1609 = vmatpush.bf16.msra.mxu3 %v2543_v18  ;;  %v2271_v18 = vor.u32 %v2803_v51, %v2270_v13 }
  0xb4   :  { %1635 = vmatpush.bf16.msrb.mxu2 %v2547_v21 }
  0xb7   :  { %v720_v31 = vpop.f32.mrf.mxu2 }
  0xb8   :  { %1636 = vmatpush.bf16.msrb.mxu2 %v2519_v34 }
  0xbf   :  { %v722_v49 = vpop.f32.mrf.mxu2 }
  0xc0   :  { %v694_v47 = vpop.f32.mrf.mxu0 }
  0xc1   :  { %v695_v48 = vadd.f32 %v694_v47, %v682_v45  ;;  %v2855_v47 = vld [vmem:[%s4353_s3 + $0x1cc] sm:$0xf] }
  0xc3   :  { %v707_v53 = vpop.f32.mrf.mxu1 }
  0xc4   :  { %v708_v57 = vadd.f32 %v707_v53, %v695_v48  ;;  %v2488_v48 = vld [vmem:[%s4353_s3 + $0x1e4] sm:$0xf0]  ;;  %v2354_v53 = vld [vmem:[%s4353_s3 + $0xb8] sm:$0xf] }
  0xc5   :  { %v2491_v49 = vor.u32 %v2855_v47, %v2488_v48  ;;  %v2355_v59 = vor.u32 %v2824_v54, %v2354_v53  ;;  %v2391_v47 = vor.u32 %v2832_v40, %v2390_v39  ;;  %v2662_v48 = vld [vmem:[%s4353_s3 + $0x320] sm:$0xf]  ;;  %v2825_v54 = vld [vmem:[%s4353_s3 + $0xd8] sm:$0xf0] }
  0xc6   :  { %v721_v63 = vadd.f32 %v720_v31, %v708_v57  ;;  %v2515_v31 = vor.u32 %v2865_v29, %v2514_v28  ;;  %v136_v57 = vperm.slane %v3862_v0, 1  ;;  %v2328_v0 = vld [vmem:[%s4353_s3 + $0x9c] sm:$0xf0]  ;;  %v2418_v29 = vld [vmem:[%s4353_s3 + $0x130] sm:$0xf] }
  0xc7   :  { %1637 = vmatpush.bf16.msrb.mxu2 %v2491_v49  ;;  %v2362_v53 = vld [vmem:[%s4353_s3 + $0xc0] sm:$0xf]  ;;  %v2909_v39 = vld [vmem:[%s4353_s3 + $0x378] sm:$0xf0] }
  0xc8   :  { %v815_v7 = vmax.f32 %v721_v63, 0.0  ;;  %v696_v11 = vpop.f32.mrf.mxu0  ;;  %v733_v17 = vpop.f32.mrf.mxu3  ;;  %1610 = vmatpush.bf16.msra.mxu3 %v2515_v31  ;;  %v2814_v63 = vld [vmem:[%s4353_s3 + $0x84] sm:$0xf]  ;;  %v2839_v31 = vld [vmem:[%s4353_s3 + $0x148] sm:$0xf0] }
  0xc9   :  { %v734_v4 = vadd.f32 %v733_v17, %v136_v57  ;;  %v2331_v2 = vor.u32 %v2814_v63, %v2328_v0  ;;  %v2299_v11 = vor.u32 %v2810_v6, %v2298_v58  ;;  %v2853_v17 = vld [vmem:[%s4353_s3 + $0x1b8] sm:$0xf0]  ;;  %v2894_v63 = vld [vmem:[%s4353_s3 + $0x300] sm:$0xf0]  ;;  %v2334_v0 = vld [vmem:[%s4353_s3 + $0x88] sm:$0xf] }
  0xca   :  { %v3982_v30 = vpack.c.bf16 %v815_v7, %v815_v7  ;;  %v2807_v7 = vld [vmem:[%s4353_s3 + $0x4c] sm:$0xf]  ;;  %v2475_v21 = vor.u32 %v2853_v17, %v2474_v16  ;;  %v2635_v58 = vor.u32 %v2894_v63, %v2634_v61  ;;  %v2606_v6 = vld [vmem:[%s4353_s3 + $0x2b0] sm:$0xf]  ;;  %v2278_v16 = vld [vmem:[%s4353_s3 + $0x18] sm:$0xf] }
  0xcb   :  { %v3987_v15 = vpop.f32.mrf.mxu2  ;;  %v709_v37 = vpop.f32.mrf.mxu1  ;;  %v2303_v12 = vor.u32 %v2807_v7, %v2300_v8  ;;  %v2887_v8 = vld [vmem:[%s4353_s3 + $0x2c8] sm:$0xf0]  ;;  %v2804_v17 = vld [vmem:[%s4353_s3 + $0x30] sm:$0xf0] }
  0xcc   :  { %1547 = vmatmul.bf16.vlgmr.msrb.gmra.mxu1 %v3982_v30  ;;  %1573 = vmatmul.bf16.vlgmr.msra.gmra.mxu0 %v3982_v30  ;;  %v2607_v13 = vor.u32 %v2887_v8, %v2606_v6  ;;  %v2867_v63 = vld [vmem:[%s4353_s3 + $0x228] sm:$0xf0] }
  0xcd   :  { %1643 = vmatpush.bf16.msrb.mxu1 %v2467_v9  ;;  %1669 = vmatpush.bf16.msra.mxu0 %v2471_v10  ;;  %v747_v9 = vadd.f32 %v3987_v15, %v734_v4  ;;  %v2272_v15 = vld [vmem:[%s4353_s3 + $0x2c] sm:$0xf0]  ;;  %v2818_v4 = vld [vmem:[%s4353_s3 + $0xa0] sm:$0xf0] }
  0xce   :  { %1611 = vmatpush.bf16.msra.mxu3 %v2487_v46  ;;  %v2275_v19 = vor.u32 %v2800_v14, %v2272_v15  ;;  %v2578_v14 = vld [vmem:[%s4353_s3 + $0x278] sm:$0xf] }
  0xd0   :  { %v735_v45 = vpop.f32.mrf.mxu3 }
  0xd1   :  { %1644 = vmatpush.bf16.msrb.mxu1 %v2439_v22  ;;  %1670 = vmatpush.bf16.msra.mxu0 %v2443_v23  ;;  %v2446_v23 = vld [vmem:[%s4353_s3 + $0x168] sm:$0xf] }
  0xd2   :  { %v2447_v28 = vor.u32 %v2846_v24, %v2446_v23  ;;  %v2873_v23 = vld [vmem:[%s4353_s3 + $0x258] sm:$0xf0]  ;;  %v2870_v24 = vld [vmem:[%s4353_s3 + $0x244] sm:$0xf] }
  0xd3   :  { %v748_v41 = vpop.f32.mrf.mxu2 }
  0xd5   :  { %1645 = vmatpush.bf16.msrb.mxu1 %v2411_v35  ;;  %1671 = vmatpush.bf16.msra.mxu0 %v2415_v36  ;;  %v2419_v35 = vor.u32 %v2839_v31, %v2418_v29  ;;  %v2690_v36 = vld [vmem:[%s4353_s3 + $0x358] sm:$0xf]  ;;  %v2866_v29 = vld [vmem:[%s4353_s3 + $0x220] sm:$0xf0]  ;;  %v2863_v31 = vld [vmem:[%s4353_s3 + $0x20c] sm:$0xf] }
  0xd6   :  { %v2691_v46 = vor.u32 %v2908_v38, %v2690_v36  ;;  %v2859_v36 = vld [vmem:[%s4353_s3 + $0x1e8] sm:$0xf0]  ;;  %v2698_v38 = vld [vmem:[%s4353_s3 + $0x360] sm:$0xf] }
  0xd9   :  { %1646 = vmatpush.bf16.msrb.mxu1 %v2383_v50  ;;  %1672 = vmatpush.bf16.msra.mxu0 %v2387_v52  ;;  %v2695_v50 = vor.u32 %v2905_v42, %v2692_v44  ;;  %v2901_v52 = vld [vmem:[%s4353_s3 + $0x338] sm:$0xf0]  ;;  %v2699_v42 = vor.u32 %v2909_v39, %v2698_v38  ;;  %v2670_v44 = vld [vmem:[%s4353_s3 + $0x328] sm:$0xf] }
  0xdc   :  { %1599 = vmatmul.bf16.vlgmr.msra.gmra.mxu1 %v3982_v30  ;;  %1625 = vmatmul.bf16.vlgmr.msrb.gmra.mxu0 %v3982_v30 }
  0xdd   :  { %1647 = vmatpush.bf16.msrb.mxu1 %v2355_v59  ;;  %1673 = vmatpush.bf16.msra.mxu0 %v2359_v60  ;;  %v2663_v59 = vor.u32 %v2901_v52, %v2662_v48  ;;  %v2363_v60 = vor.u32 %v2825_v54, %v2362_v53  ;;  %v2895_v48 = vld [vmem:[%s4353_s3 + $0x308] sm:$0xf0]  ;;  %v2614_v52 = vld [vmem:[%s4353_s3 + $0x2b8] sm:$0xf]  ;;  %v2888_v53 = vld [vmem:[%s4353_s3 + $0x2d0] sm:$0xf0] }
  0xde   :  { %v2615_v54 = vor.u32 %v2888_v53, %v2614_v52 }
  0xe0   :  { %v759_v5 = vpop.f32.mrf.mxu0 }
  0xe1   :  { %1648 = vmatpush.bf16.msrb.mxu1 %v2327_v1  ;;  %1674 = vmatpush.bf16.msra.mxu0 %v2331_v2  ;;  %v760_v3 = vadd.f32 %v759_v5, %v747_v9  ;;  %v2891_v1 = vld [vmem:[%s4353_s3 + $0x2ec] sm:$0xf]  ;;  %v2636_v2 = vld [vmem:[%s4353_s3 + $0x304] sm:$0xf0]  ;;  %v2335_v5 = vor.u32 %v2818_v4, %v2334_v0  ;;  %v2306_v9 = vld [vmem:[%s4353_s3 + $0x50] sm:$0xf] }
  0xe2   :  { %v2639_v7 = vor.u32 %v2891_v1, %v2636_v2  ;;  %v2502_v4 = vld [vmem:[%s4353_s3 + $0x1d8] sm:$0xf]  ;;  %v2860_v1 = vld [vmem:[%s4353_s3 + $0x1f0] sm:$0xf0] }
  0xe3   :  { %v772_v10 = vpop.f32.mrf.mxu1  ;;  %v2503_v2 = vor.u32 %v2860_v1, %v2502_v4 }
  0xe4   :  { %v773_v22 = vadd.f32 %v772_v10, %v760_v3  ;;  %v2811_v10 = vld [vmem:[%s4353_s3 + $0x68] sm:$0xf0]  ;;  %v2880_v3 = vld [vmem:[%s4353_s3 + $0x290] sm:$0xf0] }
  0xe5   :  { %1649 = vmatpush.bf16.msrb.mxu1 %v2299_v11  ;;  %1675 = vmatpush.bf16.msra.mxu0 %v2303_v12  ;;  %v2884_v11 = vld [vmem:[%s4353_s3 + $0x2b4] sm:$0xf]  ;;  %v2608_v12 = vld [vmem:[%s4353_s3 + $0x2cc] sm:$0xf0]  ;;  %v2307_v51 = vor.u32 %v2811_v10, %v2306_v9 }
  0xe6   :  { %v2611_v15 = vor.u32 %v2884_v11, %v2608_v12 }
  0xe8   :  { %v785_v37 = vpop.f32.mrf.mxu3  ;;  %v761_v20 = vpop.f32.mrf.mxu0 }
  0xe9   :  { %v786_v26 = vadd.f32 %v785_v37, %v773_v22  ;;  %1650 = vmatpush.bf16.msrb.mxu1 %v2271_v18  ;;  %1676 = vmatpush.bf16.msra.mxu0 %v2275_v19  ;;  %v2877_v37 = vld [vmem:[%s4353_s3 + $0x27c] sm:$0xf]  ;;  %v2580_v18 = vld [vmem:[%s4353_s3 + $0x294] sm:$0xf0]  ;;  %v2579_v19 = vor.u32 %v2880_v3, %v2578_v14  ;;  %v2279_v20 = vor.u32 %v2804_v17, %v2278_v16  ;;  %v2550_v22 = vld [vmem:[%s4353_s3 + $0x240] sm:$0xf] }
  0xeb   :  { %v798_v25 = vpop.f32.mrf.mxu2  ;;  %v774_v27 = vpop.f32.mrf.mxu1 }
  0xec   :  { %1651 = vmatmul.bf16.vlgmr.msrb.gmra.mxu1 %v3982_v30  ;;  %1677 = vmatmul.bf16.vlgmr.msra.gmra.mxu0 %v3982_v30  ;;  %v799_v32 = vadd.f32 %v798_v25, %v786_v26  ;;  %v2552_v25 = vld [vmem:[%s4353_s3 + $0x25c] sm:$0xf0]  ;;  %v2551_v26 = vor.u32 %v2873_v23, %v2550_v22 }
  0xed   :  { %1695 = vmatpush.bf16.msra.mxu1 %v2475_v21  ;;  %v2583_v21 = vor.u32 %v2877_v37, %v2580_v18  ;;  %v2555_v27 = vor.u32 %v2870_v24, %v2552_v25 }
  0xf0   :  { %v787_v33 = vpop.f32.mrf.mxu3  ;;  %v811_v34 = vpop.f32.mrf.mxu0 }
  0xf1   :  { %1696 = vmatpush.bf16.msra.mxu1 %v2447_v28  ;;  %v812_v43 = vadd.f32 %v811_v34, %v799_v32  ;;  %v2522_v28 = vld [vmem:[%s4353_s3 + $0x208] sm:$0xf] }
  0xf2   :  { %v2524_v32 = vld [vmem:[%s4353_s3 + $0x224] sm:$0xf0]  ;;  %v2523_v33 = vor.u32 %v2866_v29, %v2522_v28 }
  0xf3   :  { %v800_v41 = vpop.f32.mrf.mxu2  ;;  %v816_v45 = vmax.f32 %v812_v43, 0.0  ;;  %v2527_v34 = vor.u32 %v2863_v31, %v2524_v32  ;;  %v2856_v43 = vld [vmem:[%s4353_s3 + $0x1d4] sm:$0xf] }
  0xf5   :  { %1697 = vmatpush.bf16.msra.mxu1 %v2419_v35  ;;  %v4144_v49 = vpack.c.bf16 %v816_v45, %v816_v45  ;;  %v2494_v35 = vld [vmem:[%s4353_s3 + $0x1d0] sm:$0xf]  ;;  %v2902_v45 = vld [vmem:[%s4353_s3 + $0x340] sm:$0xf0] }
  0xf6   :  { %v2495_v40 = vor.u32 %v2859_v36, %v2494_v35 }
  0xf7   :  { %1560 = vmatmul.bf16.vlgmr.msrb.gmra.mxu3 %v4144_v49  ;;  %1586 = vmatmul.bf16.vlgmr.msra.gmra.mxu2 %v4144_v49 }
  0xf8   :  { %1656 = vmatpush.bf16.msrb.mxu3 %v2691_v46  ;;  %v813_v57 = vpop.f32.mrf.mxu0  ;;  %1682 = vmatpush.bf16.msra.mxu2 %v2695_v50  ;;  %v2671_v46 = vor.u32 %v2902_v45, %v2670_v44 }
  0xf9   :  { %1698 = vmatpush.bf16.msra.mxu1 %v2391_v47  ;;  %v2642_v47 = vld [vmem:[%s4353_s3 + $0x2f0] sm:$0xf]  ;;  %v2587_v57 = vor.u32 %v2881_v56, %v2586_v55 }
  0xfa   :  { %v2643_v50 = vor.u32 %v2895_v48, %v2642_v47 }
  0xfc   :  { %1657 = vmatpush.bf16.msrb.mxu3 %v2663_v59  ;;  %1683 = vmatpush.bf16.msra.mxu2 %v2667_v62  ;;  %v2558_v59 = vld [vmem:[%s4353_s3 + $0x248] sm:$0xf]  ;;  %v2530_v62 = vld [vmem:[%s4353_s3 + $0x210] sm:$0xf] }
  0xfd   :  { %1699 = vmatpush.bf16.msra.mxu1 %v2363_v60  ;;  %v2874_v60 = vld [vmem:[%s4353_s3 + $0x260] sm:$0xf0]  ;;  %v2531_v0 = vor.u32 %v2867_v63, %v2530_v62 }
  0xfe   :  { %v2559_v61 = vor.u32 %v2874_v60, %v2558_v59 }
 0x100   :  { %1658 = vmatpush.bf16.msrb.mxu3 %v2635_v58  ;;  %1684 = vmatpush.bf16.msra.mxu2 %v2639_v7 }
 0x101   :  { %1700 = vmatpush.bf16.msra.mxu1 %v2335_v5 }
 0x104   :  { %1659 = vmatpush.bf16.msrb.mxu3 %v2607_v13  ;;  %1685 = vmatpush.bf16.msra.mxu2 %v2611_v15 }
 0x105   :  { %1701 = vmatpush.bf16.msra.mxu1 %v2307_v51  ;;  %v4314_v51 = vld [vmem:[%s4355_s4] sm:$0x7f] }
 0x106   :  { %v950_v3 = vperm.slane %v4314_v51, 1  ;;  %v952_v28 = vperm.slane %v4314_v51, 3  ;;  %v953_v63 = vperm.slane %v4314_v51, 4 }
 0x107   :  { %1612 = vmatmul.bf16.vlgmr.msra.gmra.mxu3 %v4144_v49  ;;  %1638 = vmatmul.bf16.vlgmr.msrb.gmra.mxu2 %v4144_v49 }
 0x108   :  { %1660 = vmatpush.bf16.msrb.mxu3 %v2579_v19  ;;  %1686 = vmatpush.bf16.msra.mxu2 %v2583_v21 }
 0x109   :  { %1702 = vmatpush.bf16.msra.mxu1 %v2279_v20 }
 0x10c   :  { %1703 = vmatmul.bf16.vlgmr.msra.gmra.mxu1 %v3982_v30  ;;  %1661 = vmatpush.bf16.msrb.mxu3 %v2551_v26  ;;  %v2496_v30 = vld [vmem:[%s4353_s3 + $0x1ec] sm:$0xf0] }
 0x10d   :  { %1687 = vmatpush.bf16.msra.mxu2 %v2555_v27  ;;  %v2499_v41 = vor.u32 %v2856_v43, %v2496_v30  ;;  %v951_v27 = vperm.slane %v4314_v51, 2 }
 0x110   :  { %1662 = vmatpush.bf16.msrb.mxu3 %v2523_v33 }
 0x111   :  { %1688 = vmatpush.bf16.msra.mxu2 %v2527_v34 }
 0x114   :  { %1663 = vmatpush.bf16.msrb.mxu3 %v2495_v40 }
 0x115   :  { %1689 = vmatpush.bf16.msra.mxu2 %v2499_v41 }
 0x117   :  { %1664 = vmatmul.bf16.vlgmr.msrb.gmra.mxu3 %v4144_v49 }
 0x118   :  { %1708 = vmatpush.bf16.msra.mxu3 %v2699_v42  ;;  %1690 = vmatmul.bf16.vlgmr.msra.gmra.mxu2 %v4144_v49 }
 0x11c   :  { %1709 = vmatpush.bf16.msra.mxu3 %v2671_v46 }
 0x120   :  { %1710 = vmatpush.bf16.msra.mxu3 %v2643_v50 }
 0x124   :  { %1711 = vmatpush.bf16.msra.mxu3 %v2615_v54 }
 0x128   :  { %1712 = vmatpush.bf16.msra.mxu3 %v2587_v57 }
 0x12c   :  { %1713 = vmatpush.bf16.msra.mxu3 %v2559_v61 }
 0x130   :  { %1714 = vmatpush.bf16.msra.mxu3 %v2531_v0  ;;  %v954_v0 = vperm.slane %v4314_v51, 5 }
 0x134   :  { %1715 = vmatpush.bf16.msra.mxu3 %v2503_v2 }
 0x137   :  { %1716 = vmatmul.bf16.vlgmr.msra.gmra.mxu3 %v4144_v49  ;;  %v949_v49 = vperm.slane %v4314_v51, 0 }
 0x149   :  { %v1548_v58 = vpop.f32.mrf.mxu1  ;;  %v1574_v5 = vpop.f32.mrf.mxu0 }
 0x14a   :  { %v1549_v16 = vadd.f32 %v1548_v58, %v949_v49  ;;  %v1575_v17 = vadd.f32 %v1574_v5, %v950_v3 }
 0x151   :  { %v1550_v6 = vpop.f32.mrf.mxu1  ;;  %v1576_v7 = vpop.f32.mrf.mxu0 }
 0x159   :  { %v1600_v8 = vpop.f32.mrf.mxu1  ;;  %v1626_v9 = vpop.f32.mrf.mxu0 }
 0x15a   :  { %v1601_v35 = vadd.f32 %v1600_v8, %v951_v27  ;;  %v1627_v36 = vadd.f32 %v1626_v9, %v952_v28 }
 0x161   :  { %v1602_v10 = vpop.f32.mrf.mxu1  ;;  %v1628_v11 = vpop.f32.mrf.mxu0 }
 0x169   :  { %v4307_v12 = vpop.f32.mrf.mxu1  ;;  %v4309_v13 = vpop.f32.mrf.mxu0 }
 0x16a   :  { %v1679_v49 = vadd.f32 %v4309_v13, %v954_v0 }
 0x171   :  { %v1654_v14 = vpop.f32.mrf.mxu1  ;;  %v1680_v15 = vpop.f32.mrf.mxu0 }
 0x172   :  { %v1653_v15 = vadd.f32 %v4307_v12, %v953_v63 }
 0x17a   :  { %v1561_v37 = vpop.f32.mrf.mxu3  ;;  %v1587_v18 = vpop.f32.mrf.mxu2 }
 0x17b   :  { %v1562_v19 = vadd.f32 %v1561_v37, %v1549_v16  ;;  %v1588_v20 = vadd.f32 %v1587_v18, %v1575_v17 }
 0x17d   :  { %v1721_v21 = vsub.f32 0.0, %v1562_v19  ;;  %v1722_v22 = vsub.f32 0.0, %v1588_v20 }
 0x17f   :  { %v1728_v23 = vmul.f32 1.442695, %v1721_v21  ;;  %v1730_v24 = vmul.f32 1.442695, %v1722_v22 }
 0x181   :  { %2910 = vpow2.f32 %v1728_v23 }
 0x182   :  { %2912 = vpow2.f32 %v1730_v24  ;;  %v1563_v25 = vpop.f32.mrf.mxu3  ;;  %v1589_v26 = vpop.f32.mrf.mxu2 }
 0x187   :  { %v2911_v29 = vpop.eup %2910 }
 0x188   :  { %v2913_v31 = vpop.eup %2912  ;;  %v1742_v32 = vadd.f32 1.0, %v2911_v29 }
 0x189   :  { %v4320_v33 = vpop.f32.mrf.mxu1  ;;  %v1743_v34 = vadd.f32 1.0, %v2913_v31 }
 0x18a   :  { %2914 = vrcp.f32 %v1742_v32  ;;  %v1613_v43 = vpop.f32.mrf.mxu3  ;;  %v1639_v30 = vpop.f32.mrf.mxu2  ;;  %v1760_v55 = vand.u32 2147483648, %v1742_v32  ;;  %v1758_v59 = vand.u32 2147483647, %v1742_v32  ;;  %vm1754_vm3 = vweird.f32 %v1742_v32 }
 0x18b   :  { %2916 = vrcp.f32 %v1743_v34  ;;  %v1614_v38 = vadd.f32 %v1613_v43, %v1601_v35  ;;  %v1640_v39 = vadd.f32 %v1639_v30, %v1627_v36  ;;  %v1774_v60 = vand.u32 2147483648, %v1743_v34 }
 0x18c   :  { %v1772_v62 = vand.u32 2147483647, %v1743_v34  ;;  %v1761_v2 = vor.u32 1.1754944e-38, %v1760_v55  ;;  %vm1768_vm5 = vweird.f32 %v1743_v34  ;;  %vm1759_vm6 = vcmp.eq.f32.partialorder %v1758_v59, 8.507059e+37 }
 0x18d   :  { %v1723_v40 = vsub.f32 0.0, %v1614_v38  ;;  %v1724_v41 = vsub.f32 0.0, %v1640_v39  ;;  %v1775_v7 = vor.u32 1.1754944e-38, %v1774_v60 }
 0x18e   :  { %vm1773_vm8 = vcmp.eq.f32.partialorder %v1772_v62, 8.507059e+37 }
 0x18f   :  { %v1732_v44 = vmul.f32 1.442695, %v1723_v40  ;;  %v1734_v45 = vmul.f32 1.442695, %v1724_v41 }
 0x190   :  { %v2915_v42 = vpop.eup %2914 }
 0x191   :  { %v1706_v46 = vpop.f32.mrf.mxu1  ;;  %v2917_v47 = vpop.eup %2916  ;;  %v1750_v48 = vmul.f32 %v2915_v42, %v1742_v32  ;;  %2918 = vpow2.f32 %v1732_v44  ;;  %vm1755_vm1 = vweird.f32 %v2915_v42 }
 0x192   :  { %v1764_v50 = vmul.f32 %v2917_v47, %v1743_v34  ;;  %v1615_v52 = vpop.f32.mrf.mxu3  ;;  %v1641_v53 = vpop.f32.mrf.mxu2  ;;  %2920 = vpow2.f32 %v1734_v45  ;;  %vm1769_vm2 = vweird.f32 %v2917_v47  ;;  %vm1756_vm4 = vmor %vm1754_vm3, %vm1755_vm1 }
 0x193   :  { %v1751_v54 = vsub.f32 1.0, %v1750_v48  ;;  %vm1770_vm7 = vmor %vm1768_vm5, %vm1769_vm2 }
 0x194   :  { %v1765_v56 = vsub.f32 1.0, %v1764_v50  ;;  %v955_v50 = vperm.slane %v4314_v51, 6 }
 0x195   :  { %v1752_v57 = vmul.f32 %v2915_v42, %v1751_v54 }
 0x196   :  { %v1766_v61 = vmul.f32 %v2917_v47, %v1765_v56  ;;  %v1705_v56 = vadd.f32 %v4320_v33, %v955_v50 }
 0x197   :  { %v1753_v4 = vadd.f32 %v2915_v42, %v1752_v57  ;;  %v2919_v1 = vpop.eup %2918 }
 0x198   :  { %v1767_v58 = vadd.f32 %v2917_v47, %v1766_v61  ;;  %v2921_v5 = vpop.eup %2920  ;;  %v1744_v8 = vadd.f32 1.0, %v2919_v1 }
 0x199   :  { %v1757_v6 = vsel %vm1756_vm4, %v2915_v42, %v1753_v4  ;;  %v1745_v11 = vadd.f32 1.0, %v2921_v5 }
 0x19a   :  { %v1762_v9 = vsel %vm1759_vm6, %v1761_v2, %v1757_v6  ;;  %v1771_v10 = vsel %vm1770_vm7, %v2917_v47, %v1767_v58  ;;  %v1665_v14 = vpop.f32.mrf.mxu3  ;;  %2922 = vrcp.f32 %v1744_v8  ;;  %v1788_v27 = vand.u32 2147483648, %v1744_v8 }
 0x19b   :  { %1847 = vst [vmem:[%s4356_s5] sm:$0xff] %v1762_v9  ;;  %v1776_v3 = vsel %vm1773_vm8, %v1775_v7, %v1771_v10  ;;  %v1691_v16 = vpop.f32.mrf.mxu2  ;;  %2924 = vrcp.f32 %v1745_v11  ;;  %v1666_v17 = vadd.f32 %v1665_v14, %v1653_v15  ;;  %v1786_v31 = vand.u32 2147483647, %v1744_v8 }
 0x19c   :  { %1848 = vst [vmem:[%s4356_s5 + $0x8] sm:$0xff] %v1776_v3  ;;  %v1692_v37 = vadd.f32 %v1691_v16, %v1679_v49  ;;  %v1802_v32 = vand.u32 2147483648, %v1745_v11  ;;  %v1800_v35 = vand.u32 2147483647, %v1745_v11  ;;  %vm1782_vm11 = vweird.f32 %v1744_v8 }
 0x19d   :  { %v1725_v18 = vsub.f32 0.0, %v1666_v17  ;;  %v1789_v30 = vor.u32 1.1754944e-38, %v1788_v27  ;;  %vm1796_vm13 = vweird.f32 %v1745_v11  ;;  %vm1787_vm14 = vcmp.eq.f32.partialorder %v1786_v31, 8.507059e+37 }
 0x19e   :  { %v1726_v19 = vsub.f32 0.0, %v1692_v37  ;;  %v1803_v41 = vor.u32 1.1754944e-38, %v1802_v32  ;;  %vm1801_vm1 = vcmp.eq.f32.partialorder %v1800_v35, 8.507059e+37 }
 0x19f   :  { %v1736_v12 = vmul.f32 1.442695, %v1725_v18 }
 0x1a0   :  { %v2923_v20 = vpop.eup %2922  ;;  %v1738_v21 = vmul.f32 1.442695, %v1726_v19 }
 0x1a1   :  { %v2925_v13 = vpop.eup %2924  ;;  %v1778_v22 = vmul.f32 %v2923_v20, %v1744_v8  ;;  %2926 = vpow2.f32 %v1736_v12  ;;  %vm1783_vm9 = vweird.f32 %v2923_v20 }
 0x1a2   :  { %v1667_v23 = vpop.f32.mrf.mxu3  ;;  %v1792_v24 = vmul.f32 %v2925_v13, %v1745_v11  ;;  %2928 = vpow2.f32 %v1738_v21  ;;  %vm1797_vm10 = vweird.f32 %v2925_v13  ;;  %vm1784_vm12 = vmor %vm1782_vm11, %vm1783_vm9 }
 0x1a3   :  { %v1693_v25 = vpop.f32.mrf.mxu2  ;;  %v1779_v26 = vsub.f32 1.0, %v1778_v22  ;;  %vm1798_vm15 = vmor %vm1796_vm13, %vm1797_vm10 }
 0x1a4   :  { %v1793_v28 = vsub.f32 1.0, %v1792_v24 }
 0x1a5   :  { %v1780_v29 = vmul.f32 %v2923_v20, %v1779_v26 }
 0x1a6   :  { %v1794_v34 = vmul.f32 %v2925_v13, %v1793_v28 }
 0x1a7   :  { %v1781_v36 = vadd.f32 %v2923_v20, %v1780_v29  ;;  %v2927_v43 = vpop.eup %2926 }
 0x1a8   :  { %v1795_v38 = vadd.f32 %v2925_v13, %v1794_v34  ;;  %v2929_v39 = vpop.eup %2928  ;;  %v1746_v42 = vadd.f32 1.0, %v2927_v43 }
 0x1a9   :  { %v1785_v40 = vsel %vm1784_vm12, %v2923_v20, %v1781_v36  ;;  %v1747_v46 = vadd.f32 1.0, %v2929_v39 }
 0x1aa   :  { %v1790_v44 = vsel %vm1787_vm14, %v1789_v30, %v1785_v40  ;;  %v1799_v45 = vsel %vm1798_vm15, %v2925_v13, %v1795_v38  ;;  %2930 = vrcp.f32 %v1746_v42  ;;  %v1816_v57 = vand.u32 2147483648, %v1746_v42 }
 0x1ab   :  { %1849 = vst [vmem:[%s4356_s5 + $0x10] sm:$0xff] %v1790_v44  ;;  %v1804_v47 = vsel %vm1801_vm1, %v1803_v41, %v1799_v45  ;;  %2932 = vrcp.f32 %v1747_v46  ;;  %v1814_v61 = vand.u32 2147483647, %v1746_v42  ;;  %v1830_v62 = vand.u32 2147483648, %v1747_v46 }
 0x1ac   :  { %1850 = vst [vmem:[%s4356_s5 + $0x18] sm:$0xff] %v1804_v47  ;;  %v1828_v4 = vand.u32 2147483647, %v1747_v46  ;;  %vm1810_vm4 = vweird.f32 %v1746_v42  ;;  %v1817_v51 = vor.u32 1.1754944e-38, %v1816_v57  ;;  %vm1824_vm6 = vweird.f32 %v1747_v46 }
 0x1ad   :  { %vm1815_vm7 = vcmp.eq.f32.partialorder %v1814_v61, 8.507059e+37  ;;  %v1831_v33 = vor.u32 1.1754944e-38, %v1830_v62 }
 0x1ae   :  { %vm1829_vm9 = vcmp.eq.f32.partialorder %v1828_v4, 8.507059e+37 }
 0x1b0   :  { %v2931_v48 = vpop.eup %2930 }
 0x1b1   :  { %v2933_v52 = vpop.eup %2932  ;;  %v1806_v53 = vmul.f32 %v2931_v48, %v1746_v42  ;;  %vm1811_vm2 = vweird.f32 %v2931_v48 }
 0x1b2   :  { %v1820_v54 = vmul.f32 %v2933_v52, %v1747_v46  ;;  %vm1825_vm3 = vweird.f32 %v2933_v52  ;;  %vm1812_vm5 = vmor %vm1810_vm4, %vm1811_vm2 }
 0x1b3   :  { %v1807_v55 = vsub.f32 1.0, %v1806_v53  ;;  %vm1826_vm8 = vmor %vm1824_vm6, %vm1825_vm3 }
 0x1b4   :  { %v1821_v59 = vsub.f32 1.0, %v1820_v54 }
 0x1b5   :  { %v1808_v60 = vmul.f32 %v2931_v48, %v1807_v55 }
 0x1b6   :  { %v1822_v0 = vmul.f32 %v2933_v52, %v1821_v59 }
 0x1b7   :  { %v1809_v2 = vadd.f32 %v2931_v48, %v1808_v60 }
 0x1b8   :  { %v1823_v58 = vadd.f32 %v2933_v52, %v1822_v0 }
 0x1b9   :  { %v1813_v6 = vsel %vm1812_vm5, %v2931_v48, %v1809_v2 }
 0x1ba   :  { %v1717_v63 = vpop.f32.mrf.mxu3  ;;  %v1818_v7 = vsel %vm1815_vm7, %v1817_v51, %v1813_v6  ;;  %v1827_v8 = vsel %vm1826_vm8, %v2933_v52, %v1823_v58 }
 0x1bb   :  { %v1718_v1 = vadd.f32 %v1717_v63, %v1705_v56  ;;  %1851 = vst [vmem:[%s4356_s5 + $0x20] sm:$0xff] %v1818_v7  ;;  %v1832_v10 = vsel %vm1829_vm9, %v1831_v33, %v1827_v8 }
 0x1bc   :  { %1852 = vst [vmem:[%s4356_s5 + $0x28] sm:$0xff] %v1832_v10 }
 0x1bd   :  { %v1727_v5 = vsub.f32 0.0, %v1718_v1 }
 0x1bf   :  { %v1740_v9 = vmul.f32 1.442695, %v1727_v5 }
 0x1c1   :  { %2934 = vpow2.f32 %v1740_v9 }
 0x1c2   :  { %v1719_v11 = vpop.f32.mrf.mxu3 }
 0x1c7   :  { %v2935_v14 = vpop.eup %2934 }
 0x1c8   :  { %v1748_v15 = vadd.f32 1.0, %v2935_v14 }
 0x1ca   :  { %2936 = vrcp.f32 %v1748_v15  ;;  %v1844_v17 = vand.u32 2147483648, %v1748_v15  ;;  %v1842_v18 = vand.u32 2147483647, %v1748_v15  ;;  %vm1838_vm11 = vweird.f32 %v1748_v15 }
 0x1cc   :  { %v1845_v20 = vor.u32 1.1754944e-38, %v1844_v17  ;;  %vm1843_vm13 = vcmp.eq.f32.partialorder %v1842_v18, 8.507059e+37 }
 0x1d0   :  { %v2937_v49 = vpop.eup %2936 }
 0x1d1   :  { %v1834_v3 = vmul.f32 %v2937_v49, %v1748_v15  ;;  %vm1839_vm10 = vweird.f32 %v2937_v49 }
 0x1d2   :  { %vm1840_vm12 = vmor %vm1838_vm11, %vm1839_vm10 }
 0x1d3   :  { %v1835_v16 = vsub.f32 1.0, %v1834_v3 }
 0x1d5   :  { %v1836_v37 = vmul.f32 %v2937_v49, %v1835_v16 }
 0x1d7   :  { %v1837_v19 = vadd.f32 %v2937_v49, %v1836_v37 }
 0x1d9   :  { %v1841_v12 = vsel %vm1840_vm12, %v2937_v49, %v1837_v19 }
 0x1da   :  { %v1846_v21 = vsel %vm1843_vm13, %v1845_v20, %v1841_v12 }
 0x1db   :  { %1853 = vst.msk [vmem:[%s4356_s5 + $0x30] sm:$0xff] %vm629_vm0, %v1846_v21 }

</bundles_post_ra>
